<compile_context>
chip_gen: v5e
topology: v5e:2x2
jax: 0.10.0
libtpu: 0.0.40
codegen_flags: <defaults>
</compile_context>

<pallas_src>
import functools

import numpy as np
import jax
import jax.numpy as jnp
from jax.experimental import pallas as pl
from jax.experimental.pallas import tpu as pltpu

MATMUL_DTYPE = jnp.bfloat16  # MXU-native operand dtype; accumulation stays f32.


# ----------------------------------------------------------------------------
# Tiling helpers
# ----------------------------------------------------------------------------
def _round_up(x, m):
    return (x + m - 1) // m * m


def _pick_row_tile(m, pref=512):
    """Row tile (multiple of 8) and padded row count (multiple of the tile)."""
    tm = min(pref, _round_up(m, 8))
    return tm, _round_up(m, tm)


def _pick_div_tile(total, pref=512, align=128):
    """Largest multiple of `align` <= pref dividing `total`, else `total` (full)."""
    t = (pref // align) * align
    while t >= align:
        if total % t == 0:
            return t
        t -= align
    return total


# ----------------------------------------------------------------------------
# Pallas kernels
# ----------------------------------------------------------------------------
def _conv_matmul_kernel(p_ref, w_ref, b_ref, o_ref, *, relu):
    """out = [relu](patches @ w + b) for one row-tile (conv expressed as matmul)."""
    p = p_ref[...].astype(MATMUL_DTYPE)
    acc = jnp.dot(p, w_ref[...], preferred_element_type=jnp.float32)
    acc = acc + b_ref[...]
    if relu:
        acc = jnp.maximum(acc, 0.0)
    o_ref[...] = acc.astype(o_ref.dtype)


def conv_as_matmul(patches, w, b, *, relu, out_dtype, tile_m=512):
    """Tiled (over rows) conv-as-matmul. Weights are bf16, bias f32."""
    M, K = patches.shape
    K2, N = w.shape
    assert K == K2
    TM, Mp = _pick_row_tile(M, tile_m)
    if Mp != M:
        patches = jnp.pad(patches, ((0, Mp - M), (0, 0)))
    out_isz = np.dtype(out_dtype).itemsize
    cost = pl.CostEstimate(
        flops=2 * Mp * K * N,
        transcendentals=0,
        bytes_accessed=Mp * K * patches.dtype.itemsize + K * N * 2 + Mp * N * out_isz,
    )
    out = pl.pallas_call(
        functools.partial(_conv_matmul_kernel, relu=relu),
        grid=(Mp // TM,),
        in_specs=[
            pl.BlockSpec((TM, K), lambda i: (i, 0)),
            pl.BlockSpec((K, N), lambda i: (0, 0)),
            pl.BlockSpec((1, N), lambda i: (0, 0)),
        ],
        out_specs=pl.BlockSpec((TM, N), lambda i: (i, 0)),
        out_shape=jax.ShapeDtypeStruct((Mp, N), out_dtype),
        compiler_params=pltpu.CompilerParams(dimension_semantics=("parallel",)),
        cost_estimate=cost,
    )(patches, w, b.reshape(1, N))
    return out[:M] if Mp != M else out
    # TODO(synk): for very wide row tiles a transposed (N, TM) output layout would make
    # the stores fully lane-dense (N=16/64 still uses masked partial stores).


def _fc1_kernel(x_ref, w_ref, b_ref, g_ref, be_ref, o_ref, acc_ref, *, eps, slope):
    """x @ W1 accumulated over D tiles; at the last step: +b1, BN1(batch stats), LeakyReLU."""
    k = pl.program_id(0)

    @pl.when(k == 0)
    def _():
        acc_ref[...] = jnp.zeros_like(acc_ref)

    acc_ref[...] += jnp.dot(x_ref[...].astype(MATMUL_DTYPE), w_ref[...],
                            preferred_element_type=jnp.float32)

    @pl.when(k == pl.num_programs(0) - 1)
    def _():
        h = acc_ref[...] + b_ref[...]
        mean = jnp.mean(h, axis=0, keepdims=True)
        var = jnp.mean((h - mean) ** 2, axis=0, keepdims=True)  # biased var (BN training)
        h = (h - mean) * jax.lax.rsqrt(var + eps) * g_ref[...] + be_ref[...]
        o_ref[...] = jnp.where(h > 0, h, slope * h).astype(o_ref.dtype)


def fc1_bn_lrelu(x, w1, b1, g1, be1, *, eps, slope):
    B, D = x.shape
    H = w1.shape[1]
    TD = _pick_div_tile(D, pref=512, align=128)
    cost = pl.CostEstimate(
        flops=2 * B * D * H,
        transcendentals=H,
        bytes_accessed=B * D * x.dtype.itemsize + D * H * 2 + B * H * 4,
    )
    return pl.pallas_call(
        functools.partial(_fc1_kernel, eps=eps, slope=slope),
        grid=(D // TD,),
        in_specs=[
            pl.BlockSpec((B, TD), lambda k: (0, k)),
            pl.BlockSpec((TD, H), lambda k: (k, 0)),
            pl.BlockSpec((1, H), lambda k: (0, 0)),
            pl.BlockSpec((1, H), lambda k: (0, 0)),
            pl.BlockSpec((1, H), lambda k: (0, 0)),
        ],
        out_specs=pl.BlockSpec((B, H), lambda k: (0, 0)),
        out_shape=jax.ShapeDtypeStruct((B, H), jnp.float32),
        scratch_shapes=[pltpu.VMEM((B, H), jnp.float32)],
        compiler_params=pltpu.CompilerParams(dimension_semantics=("arbitrary",)),
        cost_estimate=cost,
    )(x, w1, b1.reshape(1, H), g1.reshape(1, H), be1.reshape(1, H))


def _fc2_kernel(h_ref, w_ref, b_ref, g_ref, be_ref, o_ref, *, eps, slope):
    """One Dout tile: h @ W2 + b2, BN2 (per-feature batch stats -> tile-local), LeakyReLU."""
    y = jnp.dot(h_ref[...].astype(MATMUL_DTYPE), w_ref[...],
                preferred_element_type=jnp.float32) + b_ref[...]
    mean = jnp.mean(y, axis=0, keepdims=True)
    var = jnp.mean((y - mean) ** 2, axis=0, keepdims=True)
    y = (y - mean) * jax.lax.rsqrt(var + eps) * g_ref[...] + be_ref[...]
    o_ref[...] = jnp.where(y > 0, y, slope * y).astype(o_ref.dtype)


def fc2_bn_lrelu(h, w2, b2, g2, be2, *, eps, slope, out_dtype):
    B, Hdim = h.shape
    Dout = w2.shape[1]
    TN = _pick_div_tile(Dout, pref=512, align=128)
    out_isz = np.dtype(out_dtype).itemsize
    cost = pl.CostEstimate(
        flops=2 * B * Hdim * Dout,
        transcendentals=Dout,
        bytes_accessed=B * Hdim * 4 + Hdim * Dout * 2 + B * Dout * out_isz,
    )
    return pl.pallas_call(
        functools.partial(_fc2_kernel, eps=eps, slope=slope),
        grid=(Dout // TN,),
        in_specs=[
            pl.BlockSpec((B, Hdim), lambda j: (0, 0)),
            pl.BlockSpec((Hdim, TN), lambda j: (0, j)),
            pl.BlockSpec((1, TN), lambda j: (0, j)),
            pl.BlockSpec((1, TN), lambda j: (0, j)),
            pl.BlockSpec((1, TN), lambda j: (0, j)),
        ],
        out_specs=pl.BlockSpec((B, TN), lambda j: (0, j)),
        out_shape=jax.ShapeDtypeStruct((B, Dout), out_dtype),
        compiler_params=pltpu.CompilerParams(dimension_semantics=("parallel",)),
        cost_estimate=cost,
    )(h, w2, b2.reshape(1, Dout), g2.reshape(1, Dout), be2.reshape(1, Dout))


# ----------------------------------------------------------------------------
# Plain-JAX glue: im2col patch extraction (pure data movement)
# ----------------------------------------------------------------------------
def im2col(x_nhwc, ksize, stride, pad):
    B, H, W, C = x_nhwc.shape
    xp = jnp.pad(x_nhwc, ((0, 0), (pad, pad), (pad, pad), (0, 0)))
    Ho = (H + 2 * pad - ksize) // stride + 1
    Wo = (W + 2 * pad - ksize) // stride + 1
    cols = []
    for kh in range(ksize):
        for kw in range(ksize):
            cols.append(xp[:, kh:kh + stride * Ho:stride, kw:kw + stride * Wo:stride, :])
    patches = jnp.stack(cols, axis=3)                  # (B, Ho, Wo, k*k, C), cols=(kh,kw,c)
    return patches.reshape(B * Ho * Wo, ksize * ksize * C), Ho, Wo


# ----------------------------------------------------------------------------
# One-time parameter re-layout
# ----------------------------------------------------------------------------
def torch_conv_w_to_matmul(w):
    # (O, I, kh, kw) -> (kh*kw*I, O), matching im2col column ordering (kh, kw, c_in)
    O, I, KH, KW = w.shape
    return jnp.transpose(w, (2, 3, 1, 0)).reshape(KH * KW * I, O)


def _build_upsample_conv_weight(conv2_w):
    """Fold Upsample(scale=2, nearest) + Conv2d(64, C, 3, 1, 1) into one matmul weight.

    out[2i+a, 2j+b, co] = bias[co] + sum_{kh,kw,ci} K[co,ci,kh,kw] *
                          FP[i + 1 + floor((a+kh-1)/2), j + 1 + floor((b+kw-1)/2), ci]
    where FP = zero-pad(pre-upsample feature, 1). So the output is a (9*Cin -> 4*Cout)
    matmul over standard 3x3/pad1 patches of the small feature map, followed by a
    pixel-shuffle of the (a, b) phase axes.
    """
    w = np.asarray(conv2_w, dtype=np.float32)          # (Cout, Cin, 3, 3)
    Cout, Cin, _, _ = w.shape
    big = np.zeros((3, 3, Cin, 2, 2, Cout), np.float32)
    for a in range(2):
        for b in range(2):
            for kh in range(3):
                for kw in range(3):
                    rr = 1 + (a + kh - 1) // 2
                    cc = 1 + (b + kw - 1) // 2
                    big[rr, cc, :, a, b, :] += w[:, :, kh, kw].T
    return big.reshape(9 * Cin, 4 * Cout)              # cols ordered (a, b, co)


def prepare_params(params, img_size):
    """bf16 matmul weights, NHWC-order fc weights (kills runtime transposes), fused up-conv."""
    ds = img_size // 2
    down_dim = 64 * ds * ds
    p = {}
    p["conv1_w"] = torch_conv_w_to_matmul(params["conv1_w"]).astype(MATMUL_DTYPE)
    p["conv1_b"] = params["conv1_b"].astype(jnp.float32)
    # fc1: permute rows from channel-major (c,h,w) flatten to NHWC (h,w,c) flatten.
    p["fc1_w"] = (params["fc1_w"].reshape(64, ds, ds, 32)
                  .transpose(1, 2, 0, 3).reshape(down_dim, 32).astype(MATMUL_DTYPE))
    p["fc1_b"] = params["fc1_b"].astype(jnp.float32)
    p["bn1_g"] = params["bn1_g"].astype(jnp.float32)
    p["bn1_b"] = params["bn1_b"].astype(jnp.float32)

    def perm_feat(v):  # per-feature vectors permuted the same way as fc2 columns
        return v.reshape(64, ds, ds).transpose(1, 2, 0).reshape(down_dim)

    p["fc2_w"] = (params["fc2_w"].reshape(32, 64, ds, ds)
                  .transpose(0, 2, 3, 1).reshape(32, down_dim).astype(MATMUL_DTYPE))
    p["fc2_b"] = perm_feat(params["fc2_b"]).astype(jnp.float32)
    p["bn2_g"] = perm_feat(params["bn2_g"]).astype(jnp.float32)
    p["bn2_b"] = perm_feat(params["bn2_b"]).astype(jnp.float32)

    p["up_w"] = jnp.asarray(_build_upsample_conv_weight(params["conv2_w"]), MATMUL_DTYPE)
    p["up_b"] = jnp.tile(params["conv2_b"].astype(jnp.float32), 4)   # (a, b, c) order
    return p


# ----------------------------------------------------------------------------
# Forward pass
# ----------------------------------------------------------------------------
def discriminator_forward(img_nchw, prep):
    B, C, H, W = img_nchw.shape
    ds = H // 2
    down_dim = 64 * ds * ds

    x = jnp.transpose(img_nchw, (0, 2, 3, 1))          # NCHW -> NHWC

    # --- down: Conv2d(C, 64, 3, stride=2, pad=1) + ReLU ---
    # TODO(synk): conv1 im2col still materializes 3x3 patches in HBM (small tensor here).
    p1, _, _ = im2col(x, ksize=3, stride=2, pad=1)                      # (B*ds*ds, 9C)
    down = conv_as_matmul(p1, prep["conv1_w"], prep["conv1_b"],
                          relu=True, out_dtype=MATMUL_DTYPE)            # (B*ds*ds, 64) bf16

    # Rows are (b, h, w) with channels last -> already NHWC-flat; fc weights were permuted
    # at prep time, so no runtime channel-major transpose is needed.
    flat = down.reshape(B, down_dim)

    # --- fc: Linear -> BN1(train, eps=0.8) -> LeakyReLU -> Linear -> BN2 -> LeakyReLU ---
    h = fc1_bn_lrelu(flat, prep["fc1_w"], prep["fc1_b"], prep["bn1_g"], prep["bn1_b"],
                     eps=0.8, slope=0.2)                                # (B, 32) f32
    y = fc2_bn_lrelu(h, prep["fc2_w"], prep["fc2_b"], prep["bn2_g"], prep["bn2_b"],
                     eps=1e-5, slope=0.2, out_dtype=MATMUL_DTYPE)       # (B, down_dim) NHWC-flat

    # --- up: Upsample(2x nearest) + Conv2d(64, C, 3, 1, 1), fused into one matmul ---
    f = y.reshape(B, ds, ds, 64)                                        # pre-upsample feature
    p2, _, _ = im2col(f, ksize=3, stride=1, pad=1)                      # (B*ds*ds, 576)
    up = conv_as_matmul(p2, prep["up_w"], prep["up_b"],
                        relu=False, out_dtype=jnp.float32)              # (B*ds*ds, 4C)
    up = (up.reshape(B, ds, ds, 2, 2, C)
            .transpose(0, 1, 3, 2, 4, 5)                                # pixel-shuffle phases
            .reshape(B, 2 * ds, 2 * ds, C))
    return jnp.transpose(up, (0, 3, 1, 2))                              # NHWC -> NCHW


# ----------------------------------------------------------------------------
# Deterministic parameter init (PyTorch-layout shapes, f32)
# ----------------------------------------------------------------------------
def init_params(key, channels, img_size):
    ds = img_size // 2
    down_dim = 64 * ds * ds
    keys = jax.random.split(key, 8)
    scale = 0.05
    return {
        "conv1_w": scale * jax.random.normal(keys[0], (64, channels, 3, 3), jnp.float32),
        "conv1_b": scale * jax.random.normal(keys[1], (64,), jnp.float32),
        "fc1_w":   scale * jax.random.normal(keys[2], (down_dim, 32), jnp.float32),
        "fc1_b":   scale * jax.random.normal(keys[3], (32,), jnp.float32),
        "bn1_g":   jnp.ones((32,), jnp.float32),
        "bn1_b":   jnp.zeros((32,), jnp.float32),
        "fc2_w":   scale * jax.random.normal(keys[4], (32, down_dim), jnp.float32),
        "fc2_b":   scale * jax.random.normal(keys[5], (down_dim,), jnp.float32),
        "bn2_g":   jnp.ones((down_dim,), jnp.float32),
        "bn2_b":   jnp.zeros((down_dim,), jnp.float32),
        "conv2_w": scale * jax.random.normal(keys[6], (channels, 64, 3, 3), jnp.float32),
        "conv2_b": scale * jax.random.normal(keys[7], (channels,), jnp.float32),
    }


if __name__ == "__main__":
    # opt.channels = 4, opt.img_size = 16, batch = 2
    B, C, IMG = 2, 4, 16
    key = jax.random.PRNGKey(0)
    k_img, k_par = jax.random.split(key)
    img = jax.random.normal(k_img, (B, C, IMG, IMG), jnp.float32)
    params = init_params(k_par, C, IMG)
    prep = prepare_params(params, IMG)   # one-time weight re-layout / bf16 cast

    fwd = jax.jit(discriminator_forward)
    out = jax.block_until_ready(fwd(img, prep))
    assert out.shape == (B, C, IMG, IMG), out.shape
    assert out.dtype == jnp.float32
    print("KERNEL_OK")
</pallas_src>

<mosaic_0001>
module attributes {stable_mosaic.version = 11 : i64} {
  func.func @_conv_matmul_kernel(%arg0: i32, %arg1: memref<128x36xf32, #tpu.memory_space<vmem>>, %arg2: memref<36x64xbf16, #tpu.memory_space<vmem>>, %arg3: memref<1x64xf32, #tpu.memory_space<vmem>>, %arg4: memref<128x64xbf16, #tpu.memory_space<vmem>>) attributes {dimension_semantics = [#tpu.dimension_semantics<parallel>], iteration_bounds = array<i64: 1>, scalar_prefetch = 0 : i64, scratch_operands = 0 : i64, tpu.core_type = #tpu.core_type<tc>, window_params = [{transform_indices = @transform_0, window_bounds = array<i64: 128, 36>}, {pipeline_mode = #tpu.pipeline_mode<synchronous>, transform_indices = @transform_1, window_bounds = array<i64: 36, 64>}, {pipeline_mode = #tpu.pipeline_mode<synchronous>, transform_indices = @transform_2, window_bounds = array<i64: 1, 64>}, {transform_indices = @transform_3, window_bounds = array<i64: 128, 64>}]} {
    %c0 = arith.constant 0 : index
    %c0_0 = arith.constant 0 : index
    %0 = vector.load %arg1[%c0, %c0_0] : memref<128x36xf32, #tpu.memory_space<vmem>>, vector<128x36xf32>
    %1 = arith.truncf %0 : vector<128x36xf32> to vector<128x36xbf16>
    %c0_1 = arith.constant 0 : index
    %c0_2 = arith.constant 0 : index
    %2 = vector.load %arg2[%c0_1, %c0_2] : memref<36x64xbf16, #tpu.memory_space<vmem>>, vector<36x64xbf16>
    %cst = arith.constant dense<0.000000e+00> : vector<128x64xf32>
    %3 = tpu.matmul %1, %2, %cst {dimension_numbers = #tpu.dot_dimension_numbers<[1], [0], [0], [1], [0, 0, 1, 1], [], []>} : vector<128x36xbf16>, vector<36x64xbf16>, vector<128x64xf32> -> vector<128x64xf32>
    %c0_3 = arith.constant 0 : index
    %c0_4 = arith.constant 0 : index
    %4 = vector.load %arg3[%c0_3, %c0_4] : memref<1x64xf32, #tpu.memory_space<vmem>>, vector<1x64xf32>
    %5 = vector.broadcast %4 : vector<1x64xf32> to vector<128x64xf32>
    %6 = arith.addf %3, %5 : vector<128x64xf32>
    %cst_5 = arith.constant 0.000000e+00 : f32
    %7 = vector.broadcast %cst_5 : f32 to vector<128x64xf32>
    %8 = arith.maximumf %6, %7 : vector<128x64xf32>
    %9 = arith.truncf %8 : vector<128x64xf32> to vector<128x64xbf16>
    %c0_6 = arith.constant 0 : index
    %c0_7 = arith.constant 0 : index
    %10 = vector.load %arg4[%c0_6, %c0_7] : memref<128x64xbf16, #tpu.memory_space<vmem>>, vector<128x64xbf16>
    tpu.vector_store %arg4[%c0_6, %c0_7], %9 {strides = array<i32>} : memref<128x64xbf16, #tpu.memory_space<vmem>>, vector<128x64xbf16>,
    return
  }
  func.func @transform_0(%arg0: i32) -> (i32, i32) {
    %c0_i32 = arith.constant 0 : i32
    %c0_i32_0 = arith.constant 0 : i32
    return %arg0, %c0_i32 : i32, i32
  }
  func.func @transform_1(%arg0: i32) -> (i32, i32) {
    %c0_i32 = arith.constant 0 : i32
    %c0_i32_0 = arith.constant 0 : i32
    %c0_i32_1 = arith.constant 0 : i32
    return %c0_i32, %c0_i32_0 : i32, i32
  }
  func.func @transform_2(%arg0: i32) -> (i32, i32) {
    %c0_i32 = arith.constant 0 : i32
    %c0_i32_0 = arith.constant 0 : i32
    %c0_i32_1 = arith.constant 0 : i32
    return %c0_i32, %c0_i32_0 : i32, i32
  }
  func.func @transform_3(%arg0: i32) -> (i32, i32) {
    %c0_i32 = arith.constant 0 : i32
    %c0_i32_0 = arith.constant 0 : i32
    return %arg0, %c0_i32 : i32, i32
  }
}

module attributes {stable_mosaic.version = 11 : i64} {
  func.func @_fc1_kernel(%arg0: i32, %arg1: memref<2x512xbf16, #tpu.memory_space<vmem>>, %arg2: memref<512x32xbf16, #tpu.memory_space<vmem>>, %arg3: memref<1x32xf32, #tpu.memory_space<vmem>>, %arg4: memref<1x32xf32, #tpu.memory_space<vmem>>, %arg5: memref<1x32xf32, #tpu.memory_space<vmem>>, %arg6: memref<2x32xf32, #tpu.memory_space<vmem>>, %arg7: memref<2x32xf32, #tpu.memory_space<vmem>>) attributes {dimension_semantics = [#tpu.dimension_semantics<arbitrary>], iteration_bounds = array<i64: 8>, scalar_prefetch = 0 : i64, scratch_operands = 1 : i64, tpu.core_type = #tpu.core_type<tc>, window_params = [{transform_indices = @transform_0, window_bounds = array<i64: 2, 512>}, {transform_indices = @transform_1, window_bounds = array<i64: 512, 32>}, {pipeline_mode = #tpu.pipeline_mode<synchronous>, transform_indices = @transform_2, window_bounds = array<i64: 1, 32>}, {pipeline_mode = #tpu.pipeline_mode<synchronous>, transform_indices = @transform_3, window_bounds = array<i64: 1, 32>}, {pipeline_mode = #tpu.pipeline_mode<synchronous>, transform_indices = @transform_4, window_bounds = array<i64: 1, 32>}, {pipeline_mode = #tpu.pipeline_mode<synchronous>, transform_indices = @transform_5, window_bounds = array<i64: 2, 32>}]} {
    %c0_i32 = arith.constant 0 : i32
    %0 = arith.cmpi eq, %arg0, %c0_i32 : i32
    %1 = arith.extui %0 : i1 to i32
    %c0_i32_0 = arith.constant 0 : i32
    %2 = arith.cmpi ne, %1, %c0_i32_0 : i32
    scf.if %2 {
      %cst_9 = arith.constant 0.000000e+00 : f32
      %12 = vector.broadcast %cst_9 : f32 to vector<2x32xf32>
      %c0_10 = arith.constant 0 : index
      %c0_11 = arith.constant 0 : index
      %13 = vector.load %arg7[%c0_10, %c0_11] : memref<2x32xf32, #tpu.memory_space<vmem>>, vector<2x32xf32>
      tpu.vector_store %arg7[%c0_10, %c0_11], %12 {strides = array<i32>} : memref<2x32xf32, #tpu.memory_space<vmem>>, vector<2x32xf32>,
    } else {
    }
    %c0 = arith.constant 0 : index
    %c0_1 = arith.constant 0 : index
    %3 = vector.load %arg7[%c0, %c0_1] : memref<2x32xf32, #tpu.memory_space<vmem>>, vector<2x32xf32>
    %c0_2 = arith.constant 0 : index
    %c0_3 = arith.constant 0 : index
    %4 = vector.load %arg1[%c0_2, %c0_3] : memref<2x512xbf16, #tpu.memory_space<vmem>>, vector<2x512xbf16>
    %c0_4 = arith.constant 0 : index
    %c0_5 = arith.constant 0 : index
    %5 = vector.load %arg2[%c0_4, %c0_5] : memref<512x32xbf16, #tpu.memory_space<vmem>>, vector<512x32xbf16>
    %cst = arith.constant dense<0.000000e+00> : vector<2x32xf32>
    %6 = tpu.matmul %4, %5, %cst {dimension_numbers = #tpu.dot_dimension_numbers<[1], [0], [0], [1], [0, 0, 1, 1], [], []>} : vector<2x512xbf16>, vector<512x32xbf16>, vector<2x32xf32> -> vector<2x32xf32>
    %7 = arith.addf %3, %6 : vector<2x32xf32>
    %c0_6 = arith.constant 0 : index
    %c0_7 = arith.constant 0 : index
    %8 = vector.load %arg7[%c0_6, %c0_7] : memref<2x32xf32, #tpu.memory_space<vmem>>, vector<2x32xf32>
    tpu.vector_store %arg7[%c0_6, %c0_7], %7 {strides = array<i32>} : memref<2x32xf32, #tpu.memory_space<vmem>>, vector<2x32xf32>,
    %c7_i32 = arith.constant 7 : i32
    %9 = arith.cmpi eq, %arg0, %c7_i32 : i32
    %10 = arith.extui %9 : i1 to i32
    %c0_i32_8 = arith.constant 0 : i32
    %11 = arith.cmpi ne, %10, %c0_i32_8 : i32
    scf.if %11 {
      %c0_9 = arith.constant 0 : index
      %c0_10 = arith.constant 0 : index
      %12 = vector.load %arg7[%c0_9, %c0_10] : memref<2x32xf32, #tpu.memory_space<vmem>>, vector<2x32xf32>
      %c0_11 = arith.constant 0 : index
      %c0_12 = arith.constant 0 : index
      %13 = vector.load %arg3[%c0_11, %c0_12] : memref<1x32xf32, #tpu.memory_space<vmem>>, vector<1x32xf32>
      %14 = vector.broadcast %13 : vector<1x32xf32> to vector<2x32xf32>
      %15 = arith.addf %12, %14 : vector<2x32xf32>
      %cst_13 = arith.constant dense<0.000000e+00> : vector<32xf32>
      %16 = vector.multi_reduction <add>, %15, %cst_13 [0] : vector<2x32xf32> to vector<32xf32>
      %17 = vector.shape_cast %16 : vector<32xf32> to vector<1x32xf32>
      %cst_14 = arith.constant 2.000000e+00 : f32
      %18 = vector.broadcast %cst_14 : f32 to vector<1x32xf32>
      %19 = arith.divf %17, %18 : vector<1x32xf32>
      %20 = vector.broadcast %19 : vector<1x32xf32> to vector<2x32xf32>
      %21 = arith.subf %15, %20 : vector<2x32xf32>
      %22 = arith.mulf %21, %21 : vector<2x32xf32>
      %cst_15 = arith.constant dense<0.000000e+00> : vector<32xf32>
      %23 = vector.multi_reduction <add>, %22, %cst_15 [0] : vector<2x32xf32> to vector<32xf32>
      %24 = vector.shape_cast %23 : vector<32xf32> to vector<1x32xf32>
      %cst_16 = arith.constant 2.000000e+00 : f32
      %25 = vector.broadcast %cst_16 : f32 to vector<1x32xf32>
      %26 = arith.divf %24, %25 : vector<1x32xf32>
      %27 = vector.broadcast %19 : vector<1x32xf32> to vector<2x32xf32>
      %28 = arith.subf %15, %27 : vector<2x32xf32>
      %cst_17 = arith.constant 8.000000e-01 : f32
      %29 = vector.broadcast %cst_17 : f32 to vector<1x32xf32>
      %30 = arith.addf %26, %29 : vector<1x32xf32>
      %31 = math.rsqrt %30 : vector<1x32xf32>
      %32 = vector.broadcast %31 : vector<1x32xf32> to vector<2x32xf32>
      %33 = arith.mulf %28, %32 : vector<2x32xf32>
      %c0_18 = arith.constant 0 : index
      %c0_19 = arith.constant 0 : index
      %34 = vector.load %arg4[%c0_18, %c0_19] : memref<1x32xf32, #tpu.memory_space<vmem>>, vector<1x32xf32>
      %35 = vector.broadcast %34 : vector<1x32xf32> to vector<2x32xf32>
      %36 = arith.mulf %33, %35 : vector<2x32xf32>
      %c0_20 = arith.constant 0 : index
      %c0_21 = arith.constant 0 : index
      %37 = vector.load %arg5[%c0_20, %c0_21] : memref<1x32xf32, #tpu.memory_space<vmem>>, vector<1x32xf32>
      %38 = vector.broadcast %37 : vector<1x32xf32> to vector<2x32xf32>
      %39 = arith.addf %36, %38 : vector<2x32xf32>
      %cst_22 = arith.constant 0.000000e+00 : f32
      %40 = vector.broadcast %cst_22 : f32 to vector<2x32xf32>
      %41 = arith.cmpf ogt, %39, %40 : vector<2x32xf32>
      %cst_23 = arith.constant 2.000000e-01 : f32
      %42 = vector.broadcast %cst_23 : f32 to vector<2x32xf32>
      %43 = arith.mulf %42, %39 : vector<2x32xf32>
      %44 = arith.select %41, %39, %43 : vector<2x32xi1>, vector<2x32xf32>
      %c0_24 = arith.constant 0 : index
      %c0_25 = arith.constant 0 : index
      %45 = vector.load %arg6[%c0_24, %c0_25] : memref<2x32xf32, #tpu.memory_space<vmem>>, vector<2x32xf32>
      tpu.vector_store %arg6[%c0_24, %c0_25], %44 {strides = array<i32>} : memref<2x32xf32, #tpu.memory_space<vmem>>, vector<2x32xf32>,
    } else {
    }
    return
  }
  func.func @transform_0(%arg0: i32) -> (i32, i32) {
    %c0_i32 = arith.constant 0 : i32
    %c0_i32_0 = arith.constant 0 : i32
    return %c0_i32, %arg0 : i32, i32
  }
  func.func @transform_1(%arg0: i32) -> (i32, i32) {
    %c0_i32 = arith.constant 0 : i32
    %c0_i32_0 = arith.constant 0 : i32
    return %arg0, %c0_i32 : i32, i32
  }
  func.func @transform_2(%arg0: i32) -> (i32, i32) {
    %c0_i32 = arith.constant 0 : i32
    %c0_i32_0 = arith.constant 0 : i32
    %c0_i32_1 = arith.constant 0 : i32
    return %c0_i32, %c0_i32_0 : i32, i32
  }
  func.func @transform_3(%arg0: i32) -> (i32, i32) {
    %c0_i32 = arith.constant 0 : i32
    %c0_i32_0 = arith.constant 0 : i32
    %c0_i32_1 = arith.constant 0 : i32
    return %c0_i32, %c0_i32_0 : i32, i32
  }
  func.func @transform_4(%arg0: i32) -> (i32, i32) {
    %c0_i32 = arith.constant 0 : i32
    %c0_i32_0 = arith.constant 0 : i32
    %c0_i32_1 = arith.constant 0 : i32
    return %c0_i32, %c0_i32_0 : i32, i32
  }
  func.func @transform_5(%arg0: i32) -> (i32, i32) {
    %c0_i32 = arith.constant 0 : i32
    %c0_i32_0 = arith.constant 0 : i32
    %c0_i32_1 = arith.constant 0 : i32
    return %c0_i32, %c0_i32_0 : i32, i32
  }
}

module attributes {stable_mosaic.version = 11 : i64} {
  func.func @_fc2_kernel(%arg0: i32, %arg1: memref<2x32xf32, #tpu.memory_space<vmem>>, %arg2: memref<32x512xbf16, #tpu.memory_space<vmem>>, %arg3: memref<1x512xf32, #tpu.memory_space<vmem>>, %arg4: memref<1x512xf32, #tpu.memory_space<vmem>>, %arg5: memref<1x512xf32, #tpu.memory_space<vmem>>, %arg6: memref<2x512xbf16, #tpu.memory_space<vmem>>) attributes {dimension_semantics = [#tpu.dimension_semantics<parallel>], iteration_bounds = array<i64: 8>, scalar_prefetch = 0 : i64, scratch_operands = 0 : i64, tpu.core_type = #tpu.core_type<tc>, window_params = [{pipeline_mode = #tpu.pipeline_mode<synchronous>, transform_indices = @transform_0, window_bounds = array<i64: 2, 32>}, {transform_indices = @transform_1, window_bounds = array<i64: 32, 512>}, {transform_indices = @transform_2, window_bounds = array<i64: 1, 512>}, {transform_indices = @transform_3, window_bounds = array<i64: 1, 512>}, {transform_indices = @transform_4, window_bounds = array<i64: 1, 512>}, {transform_indices = @transform_5, window_bounds = array<i64: 2, 512>}]} {
    %c0 = arith.constant 0 : index
    %c0_0 = arith.constant 0 : index
    %0 = vector.load %arg1[%c0, %c0_0] : memref<2x32xf32, #tpu.memory_space<vmem>>, vector<2x32xf32>
    %1 = arith.truncf %0 : vector<2x32xf32> to vector<2x32xbf16>
    %c0_1 = arith.constant 0 : index
    %c0_2 = arith.constant 0 : index
    %2 = vector.load %arg2[%c0_1, %c0_2] : memref<32x512xbf16, #tpu.memory_space<vmem>>, vector<32x512xbf16>
    %cst = arith.constant dense<0.000000e+00> : vector<2x512xf32>
    %3 = tpu.matmul %1, %2, %cst {dimension_numbers = #tpu.dot_dimension_numbers<[1], [0], [0], [1], [0, 0, 1, 1], [], []>} : vector<2x32xbf16>, vector<32x512xbf16>, vector<2x512xf32> -> vector<2x512xf32>
    %c0_3 = arith.constant 0 : index
    %c0_4 = arith.constant 0 : index
    %4 = vector.load %arg3[%c0_3, %c0_4] : memref<1x512xf32, #tpu.memory_space<vmem>>, vector<1x512xf32>
    %5 = vector.broadcast %4 : vector<1x512xf32> to vector<2x512xf32>
    %6 = arith.addf %3, %5 : vector<2x512xf32>
    %cst_5 = arith.constant dense<0.000000e+00> : vector<512xf32>
    %7 = vector.multi_reduction <add>, %6, %cst_5 [0] : vector<2x512xf32> to vector<512xf32>
    %8 = vector.shape_cast %7 : vector<512xf32> to vector<1x512xf32>
    %cst_6 = arith.constant 2.000000e+00 : f32
    %9 = vector.broadcast %cst_6 : f32 to vector<1x512xf32>
    %10 = arith.divf %8, %9 : vector<1x512xf32>
    %11 = vector.broadcast %10 : vector<1x512xf32> to vector<2x512xf32>
    %12 = arith.subf %6, %11 : vector<2x512xf32>
    %13 = arith.mulf %12, %12 : vector<2x512xf32>
    %cst_7 = arith.constant dense<0.000000e+00> : vector<512xf32>
    %14 = vector.multi_reduction <add>, %13, %cst_7 [0] : vector<2x512xf32> to vector<512xf32>
    %15 = vector.shape_cast %14 : vector<512xf32> to vector<1x512xf32>
    %cst_8 = arith.constant 2.000000e+00 : f32
    %16 = vector.broadcast %cst_8 : f32 to vector<1x512xf32>
    %17 = arith.divf %15, %16 : vector<1x512xf32>
    %18 = vector.broadcast %10 : vector<1x512xf32> to vector<2x512xf32>
    %19 = arith.subf %6, %18 : vector<2x512xf32>
    %cst_9 = arith.constant 9.99999974E-6 : f32
    %20 = vector.broadcast %cst_9 : f32 to vector<1x512xf32>
    %21 = arith.addf %17, %20 : vector<1x512xf32>
    %22 = math.rsqrt %21 : vector<1x512xf32>
    %23 = vector.broadcast %22 : vector<1x512xf32> to vector<2x512xf32>
    %24 = arith.mulf %19, %23 : vector<2x512xf32>
    %c0_10 = arith.constant 0 : index
    %c0_11 = arith.constant 0 : index
    %25 = vector.load %arg4[%c0_10, %c0_11] : memref<1x512xf32, #tpu.memory_space<vmem>>, vector<1x512xf32>
    %26 = vector.broadcast %25 : vector<1x512xf32> to vector<2x512xf32>
    %27 = arith.mulf %24, %26 : vector<2x512xf32>
    %c0_12 = arith.constant 0 : index
    %c0_13 = arith.constant 0 : index
    %28 = vector.load %arg5[%c0_12, %c0_13] : memref<1x512xf32, #tpu.memory_space<vmem>>, vector<1x512xf32>
    %29 = vector.broadcast %28 : vector<1x512xf32> to vector<2x512xf32>
    %30 = arith.addf %27, %29 : vector<2x512xf32>
    %cst_14 = arith.constant 0.000000e+00 : f32
    %31 = vector.broadcast %cst_14 : f32 to vector<2x512xf32>
    %32 = arith.cmpf ogt, %30, %31 : vector<2x512xf32>
    %cst_15 = arith.constant 2.000000e-01 : f32
    %33 = vector.broadcast %cst_15 : f32 to vector<2x512xf32>
    %34 = arith.mulf %33, %30 : vector<2x512xf32>
    %35 = arith.select %32, %30, %34 : vector<2x512xi1>, vector<2x512xf32>
    %36 = arith.truncf %35 : vector<2x512xf32> to vector<2x512xbf16>
    %c0_16 = arith.constant 0 : index
    %c0_17 = arith.constant 0 : index
    %37 = vector.load %arg6[%c0_16, %c0_17] : memref<2x512xbf16, #tpu.memory_space<vmem>>, vector<2x512xbf16>
    tpu.vector_store %arg6[%c0_16, %c0_17], %36 {strides = array<i32>} : memref<2x512xbf16, #tpu.memory_space<vmem>>, vector<2x512xbf16>,
    return
  }
  func.func @transform_0(%arg0: i32) -> (i32, i32) {
    %c0_i32 = arith.constant 0 : i32
    %c0_i32_0 = arith.constant 0 : i32
    %c0_i32_1 = arith.constant 0 : i32
    return %c0_i32, %c0_i32_0 : i32, i32
  }
  func.func @transform_1(%arg0: i32) -> (i32, i32) {
    %c0_i32 = arith.constant 0 : i32
    %c0_i32_0 = arith.constant 0 : i32
    return %c0_i32, %arg0 : i32, i32
  }
  func.func @transform_2(%arg0: i32) -> (i32, i32) {
    %c0_i32 = arith.constant 0 : i32
    %c0_i32_0 = arith.constant 0 : i32
    return %c0_i32, %arg0 : i32, i32
  }
  func.func @transform_3(%arg0: i32) -> (i32, i32) {
    %c0_i32 = arith.constant 0 : i32
    %c0_i32_0 = arith.constant 0 : i32
    return %c0_i32, %arg0 : i32, i32
  }
  func.func @transform_4(%arg0: i32) -> (i32, i32) {
    %c0_i32 = arith.constant 0 : i32
    %c0_i32_0 = arith.constant 0 : i32
    return %c0_i32, %arg0 : i32, i32
  }
  func.func @transform_5(%arg0: i32) -> (i32, i32) {
    %c0_i32 = arith.constant 0 : i32
    %c0_i32_0 = arith.constant 0 : i32
    return %c0_i32, %arg0 : i32, i32
  }
}

module attributes {stable_mosaic.version = 11 : i64} {
  func.func @_conv_matmul_kernel(%arg0: i32, %arg1: memref<128x576xbf16, #tpu.memory_space<vmem>>, %arg2: memref<576x16xbf16, #tpu.memory_space<vmem>>, %arg3: memref<1x16xf32, #tpu.memory_space<vmem>>, %arg4: memref<128x16xf32, #tpu.memory_space<vmem>>) attributes {dimension_semantics = [#tpu.dimension_semantics<parallel>], iteration_bounds = array<i64: 1>, scalar_prefetch = 0 : i64, scratch_operands = 0 : i64, tpu.core_type = #tpu.core_type<tc>, window_params = [{transform_indices = @transform_0, window_bounds = array<i64: 128, 576>}, {pipeline_mode = #tpu.pipeline_mode<synchronous>, transform_indices = @transform_1, window_bounds = array<i64: 576, 16>}, {pipeline_mode = #tpu.pipeline_mode<synchronous>, transform_indices = @transform_2, window_bounds = array<i64: 1, 16>}, {transform_indices = @transform_3, window_bounds = array<i64: 128, 16>}]} {
    %c0 = arith.constant 0 : index
    %c0_0 = arith.constant 0 : index
    %0 = vector.load %arg1[%c0, %c0_0] : memref<128x576xbf16, #tpu.memory_space<vmem>>, vector<128x576xbf16>
    %c0_1 = arith.constant 0 : index
    %c0_2 = arith.constant 0 : index
    %1 = vector.load %arg2[%c0_1, %c0_2] : memref<576x16xbf16, #tpu.memory_space<vmem>>, vector<576x16xbf16>
    %cst = arith.constant dense<0.000000e+00> : vector<128x16xf32>
    %2 = tpu.matmul %0, %1, %cst {dimension_numbers = #tpu.dot_dimension_numbers<[1], [0], [0], [1], [0, 0, 1, 1], [], []>} : vector<128x576xbf16>, vector<576x16xbf16>, vector<128x16xf32> -> vector<128x16xf32>
    %c0_3 = arith.constant 0 : index
    %c0_4 = arith.constant 0 : index
    %3 = vector.load %arg3[%c0_3, %c0_4] : memref<1x16xf32, #tpu.memory_space<vmem>>, vector<1x16xf32>
    %4 = vector.broadcast %3 : vector<1x16xf32> to vector<128x16xf32>
    %5 = arith.addf %2, %4 : vector<128x16xf32>
    %c0_5 = arith.constant 0 : index
    %c0_6 = arith.constant 0 : index
    %6 = vector.load %arg4[%c0_5, %c0_6] : memref<128x16xf32, #tpu.memory_space<vmem>>, vector<128x16xf32>
    tpu.vector_store %arg4[%c0_5, %c0_6], %5 {strides = array<i32>} : memref<128x16xf32, #tpu.memory_space<vmem>>, vector<128x16xf32>,
    return
  }
  func.func @transform_0(%arg0: i32) -> (i32, i32) {
    %c0_i32 = arith.constant 0 : i32
    %c0_i32_0 = arith.constant 0 : i32
    return %arg0, %c0_i32 : i32, i32
  }
  func.func @transform_1(%arg0: i32) -> (i32, i32) {
    %c0_i32 = arith.constant 0 : i32
    %c0_i32_0 = arith.constant 0 : i32
    %c0_i32_1 = arith.constant 0 : i32
    return %c0_i32, %c0_i32_0 : i32, i32
  }
  func.func @transform_2(%arg0: i32) -> (i32, i32) {
    %c0_i32 = arith.constant 0 : i32
    %c0_i32_0 = arith.constant 0 : i32
    %c0_i32_1 = arith.constant 0 : i32
    return %c0_i32, %c0_i32_0 : i32, i32
  }
  func.func @transform_3(%arg0: i32) -> (i32, i32) {
    %c0_i32 = arith.constant 0 : i32
    %c0_i32_0 = arith.constant 0 : i32
    return %arg0, %c0_i32 : i32, i32
  }
}

</mosaic_0001>

<bundles_post_ra>
// kernel: discriminator_forward.4
= control target key start
LH: loop header
LB: loop body
LE: loop exit
PB: predicated region body
PF: predicated region fallthrough
CT: control target
= control target key end

     0   :  { %vm88_vm0 = vcmask 1041408   ;;  %vm63_vm1 = vcmask 293888   ;;  %vm173_vm2 = vcmask 519168   ;;  %s392_s1 = inlined_call_operand.vmem [shape: bf16[36,64], index: 1, kind: input, shape index: {}]   ;;  %s393_s2 = inlined_call_operand.vmem [shape: f32[1,64], index: 2, kind: input, shape index: {}]   ;;  %s394_s0 = inlined_call_operand.vmem [shape: f32[128,36], index: 0, kind: input, shape index: {}]   ;;  %s395_s3 = inlined_call_operand.vmem [shape: bf16[128,64], index: 3, kind: output, shape index: {}]  }
   0x1   :  { %v43_v0 = vld [vmem:[%s392_s1 + $0x10] sm:$0x3]  ;;  %v211_v4 = vld [vmem:[%s392_s1 + $0x8] sm:$0xff]  ;;  %v210_v5 = vld [vmem:[%s392_s1] sm:$0xff] }
   0x2   :  { %v57_v1 = vunpack.c.l.b16 %v43_v0  ;;  %v15_v6 = vld [vmem:[%s394_s0] sm:$0xff]  ;;  %v16_v7 = vld [vmem:[%s394_s0 + $0x8] sm:$0xff]  ;;  %v17_v18 = vld [vmem:[%s394_s0 + $0x10] sm:$0xff] }
   0x3   :  { %v19_v8 = vld [vmem:[%s394_s0 + $0x20] sm:$0xff]  ;;  %v20_v9 = vld [vmem:[%s394_s0 + $0x28] sm:$0xff]  ;;  %v31_v14 = vpack.c.bf16 %v16_v7, %v15_v6  ;;  %v18_v19 = vld [vmem:[%s394_s0 + $0x18] sm:$0xff] }
   0x4   :  { %v60_v2 = vpack.c.b16 %v57_v1, %v57_v1  ;;  %v23_v10 = vld [vmem:[%s394_s0 + $0x40] sm:$0xff]  ;;  %v24_v11 = vld [vmem:[%s394_s0 + $0x48] sm:$0xff]  ;;  %v33_v15 = vpack.c.bf16 %v20_v9, %v19_v8  ;;  %v21_v20 = vld [vmem:[%s394_s0 + $0x30] sm:$0xff]  ;;  %v32_v26 = vpack.c.bf16 %v18_v19, %v17_v18 }
   0x5   :  { %v27_v12 = vld [vmem:[%s394_s0 + $0x60] sm:$0xff]  ;;  %v28_v13 = vld [vmem:[%s394_s0 + $0x68] sm:$0xff]  ;;  %v35_v16 = vpack.c.bf16 %v24_v11, %v23_v10  ;;  %v22_v21 = vld [vmem:[%s394_s0 + $0x38] sm:$0xff] }
   0x6   :  { %v90_v3 = vsel %vm88_vm0, %v60_v2, 0  ;;  %v37_v17 = vpack.c.bf16 %v28_v13, %v27_v12  ;;  %v25_v22 = vld [vmem:[%s394_s0 + $0x50] sm:$0xff]  ;;  %v26_v23 = vld [vmem:[%s394_s0 + $0x58] sm:$0xff]  ;;  %v34_v27 = vpack.c.bf16 %v22_v21, %v21_v20  ;;  %v310_v30 = vld [vmem:[%s393_s2] ss:$0 sm:$0xff] }
   0x7   :  { %97 = vmatpush.bf16.msra.mxu0 %v90_v3  ;;  %212 = vmatpush.bf16.msra.mxu1 %v90_v3  ;;  %v29_v24 = vld [vmem:[%s394_s0 + $0x70] sm:$0xff]  ;;  %v30_v25 = vld [vmem:[%s394_s0 + $0x78] sm:$0xff]  ;;  %v36_v28 = vpack.c.bf16 %v26_v23, %v25_v22 }
   0x8   :  { %213 = vmatpush.bf16.msra.mxu2 %v90_v3  ;;  %214 = vmatpush.bf16.msra.mxu3 %v90_v3  ;;  %v38_v29 = vpack.c.bf16 %v30_v25, %v29_v24 }
   0xb   :  { %98 = vmatpush.bf16.msra.mxu0 %v211_v4  ;;  %215 = vmatpush.bf16.msra.mxu1 %v211_v4 }
   0xc   :  { %216 = vmatpush.bf16.msra.mxu2 %v211_v4  ;;  %217 = vmatpush.bf16.msra.mxu3 %v211_v4 }
   0xf   :  { %99 = vmatpush.bf16.msra.mxu0 %v210_v5  ;;  %218 = vmatpush.bf16.msra.mxu1 %v210_v5 }
  0x10   :  { %219 = vmatpush.bf16.msra.mxu2 %v210_v5  ;;  %220 = vmatpush.bf16.msra.mxu3 %v210_v5 }
  0x12   :  { %202 = vmatmul.msk.bf16.vlgmr.msra.gmra.mxu0 %vm63_vm1, %v31_v14  ;;  %204 = vmatmul.msk.bf16.vlgmr.msra.gmra.mxu1 %vm63_vm1, %v33_v15 }
  0x13   :  { %206 = vmatmul.msk.bf16.vlgmr.msra.gmra.mxu2 %vm63_vm1, %v35_v16  ;;  %208 = vmatmul.msk.bf16.vlgmr.msra.gmra.mxu3 %vm63_vm1, %v37_v17 }
  0x22   :  { %203 = vmatmul.msk.bf16.gmra.mxu0 %vm63_vm1, %v32_v26  ;;  %205 = vmatmul.msk.bf16.gmra.mxu1 %vm63_vm1, %v34_v27 }
  0x23   :  { %207 = vmatmul.msk.bf16.gmra.mxu2 %vm63_vm1, %v36_v28  ;;  %209 = vmatmul.msk.bf16.gmra.mxu3 %vm63_vm1, %v38_v29 }
  0x8f   :  { %v101_v31 = vpop.f32.mrf.mxu0  ;;  %v111_v32 = vpop.f32.mrf.mxu1 }
  0x90   :  { %v102_v33 = vadd.f32 %v310_v30, %v101_v31  ;;  %v112_v34 = vadd.f32 %v310_v30, %v111_v32 }
  0x92   :  { %v141_v35 = vmax.f32 %v102_v33, 0.0  ;;  %v145_v36 = vmax.f32 %v112_v34, 0.0 }
  0x94   :  { %v157_v37 = vpack.c.bf16 %v141_v35, %v141_v35  ;;  %v161_v38 = vpack.c.bf16 %v145_v36, %v145_v36 }
  0x96   :  { %174 = vst.msk [vmem:[%s395_s3] sm:$0xf] %vm173_vm2, %v157_v37  ;;  %v121_v39 = vpop.f32.mrf.mxu2  ;;  %v131_v40 = vpop.f32.mrf.mxu3 }
  0x97   :  { %178 = vst.msk [vmem:[%s395_s3 + $0x10] sm:$0xf] %vm173_vm2, %v161_v38  ;;  %v122_v41 = vadd.f32 %v310_v30, %v121_v39  ;;  %v132_v42 = vadd.f32 %v310_v30, %v131_v40  ;;  %v103_v43 = vpop.f32.mrf.mxu0  ;;  %v113_v44 = vpop.f32.mrf.mxu1 }
  0x98   :  { %v104_v45 = vadd.f32 %v310_v30, %v103_v43  ;;  %v114_v46 = vadd.f32 %v310_v30, %v113_v44 }
  0x99   :  { %v149_v47 = vmax.f32 %v122_v41, 0.0  ;;  %v153_v48 = vmax.f32 %v132_v42, 0.0 }
  0x9a   :  { %v142_v49 = vmax.f32 %v104_v45, 0.0  ;;  %v146_v50 = vmax.f32 %v114_v46, 0.0 }
  0x9b   :  { %v165_v51 = vpack.c.bf16 %v149_v47, %v149_v47  ;;  %v169_v52 = vpack.c.bf16 %v153_v48, %v153_v48 }
  0x9c   :  { %v158_v53 = vpack.c.bf16 %v142_v49, %v142_v49  ;;  %v162_v54 = vpack.c.bf16 %v146_v50, %v146_v50 }
  0x9d   :  { %182 = vst.msk [vmem:[%s395_s3 + $0x20] sm:$0xf] %vm173_vm2, %v165_v51 }
  0x9e   :  { %186 = vst.msk [vmem:[%s395_s3 + $0x30] sm:$0xf] %vm173_vm2, %v169_v52  ;;  %v123_v55 = vpop.f32.mrf.mxu2  ;;  %v133_v56 = vpop.f32.mrf.mxu3 }
  0x9f   :  { %175 = vst.msk [vmem:[%s395_s3 + $0x4] sm:$0xf] %vm173_vm2, %v158_v53  ;;  %v124_v57 = vadd.f32 %v310_v30, %v123_v55  ;;  %v134_v58 = vadd.f32 %v310_v30, %v133_v56  ;;  %v106_v59 = vpop.f32.mrf.mxu0  ;;  %v116_v60 = vpop.f32.mrf.mxu1 }
  0xa0   :  { %179 = vst.msk [vmem:[%s395_s3 + $0x14] sm:$0xf] %vm173_vm2, %v162_v54  ;;  %v107_v61 = vadd.f32 %v310_v30, %v106_v59  ;;  %v117_v62 = vadd.f32 %v310_v30, %v116_v60 }
  0xa1   :  { %v150_v63 = vmax.f32 %v124_v57, 0.0  ;;  %v154_v0 = vmax.f32 %v134_v58, 0.0 }
  0xa2   :  { %v143_v1 = vmax.f32 %v107_v61, 0.0  ;;  %v147_v2 = vmax.f32 %v117_v62, 0.0 }
  0xa3   :  { %v166_v3 = vpack.c.bf16 %v150_v63, %v150_v63  ;;  %v170_v4 = vpack.c.bf16 %v154_v0, %v154_v0 }
  0xa4   :  { %v159_v5 = vpack.c.bf16 %v143_v1, %v143_v1  ;;  %v163_v6 = vpack.c.bf16 %v147_v2, %v147_v2 }
  0xa5   :  { %183 = vst.msk [vmem:[%s395_s3 + $0x24] sm:$0xf] %vm173_vm2, %v166_v3 }
  0xa6   :  { %187 = vst.msk [vmem:[%s395_s3 + $0x34] sm:$0xf] %vm173_vm2, %v170_v4  ;;  %v126_v7 = vpop.f32.mrf.mxu2  ;;  %v136_v8 = vpop.f32.mrf.mxu3 }
  0xa7   :  { %176 = vst.msk [vmem:[%s395_s3 + $0x8] sm:$0xf] %vm173_vm2, %v159_v5  ;;  %v127_v9 = vadd.f32 %v310_v30, %v126_v7  ;;  %v137_v10 = vadd.f32 %v310_v30, %v136_v8  ;;  %v108_v11 = vpop.f32.mrf.mxu0  ;;  %v118_v12 = vpop.f32.mrf.mxu1 }
  0xa8   :  { %180 = vst.msk [vmem:[%s395_s3 + $0x18] sm:$0xf] %vm173_vm2, %v163_v6  ;;  %v109_v13 = vadd.f32 %v310_v30, %v108_v11  ;;  %v119_v14 = vadd.f32 %v310_v30, %v118_v12 }
  0xa9   :  { %v151_v15 = vmax.f32 %v127_v9, 0.0  ;;  %v155_v16 = vmax.f32 %v137_v10, 0.0 }
  0xaa   :  { %v144_v17 = vmax.f32 %v109_v13, 0.0  ;;  %v148_v18 = vmax.f32 %v119_v14, 0.0 }
  0xab   :  { %v167_v19 = vpack.c.bf16 %v151_v15, %v151_v15  ;;  %v171_v20 = vpack.c.bf16 %v155_v16, %v155_v16 }
  0xac   :  { %v160_v21 = vpack.c.bf16 %v144_v17, %v144_v17  ;;  %v164_v22 = vpack.c.bf16 %v148_v18, %v148_v18 }
  0xad   :  { %184 = vst.msk [vmem:[%s395_s3 + $0x28] sm:$0xf] %vm173_vm2, %v167_v19 }
  0xae   :  { %188 = vst.msk [vmem:[%s395_s3 + $0x38] sm:$0xf] %vm173_vm2, %v171_v20  ;;  %v128_v23 = vpop.f32.mrf.mxu2  ;;  %v138_v24 = vpop.f32.mrf.mxu3 }
  0xaf   :  { %177 = vst.msk [vmem:[%s395_s3 + $0xc] sm:$0xf] %vm173_vm2, %v160_v21  ;;  %v129_v25 = vadd.f32 %v310_v30, %v128_v23  ;;  %v139_v26 = vadd.f32 %v310_v30, %v138_v24 }
  0xb0   :  { %181 = vst.msk [vmem:[%s395_s3 + $0x1c] sm:$0xf] %vm173_vm2, %v164_v22 }
  0xb1   :  { %v152_v27 = vmax.f32 %v129_v25, 0.0  ;;  %v156_v28 = vmax.f32 %v139_v26, 0.0 }
  0xb3   :  { %v168_v29 = vpack.c.bf16 %v152_v27, %v152_v27  ;;  %v172_v31 = vpack.c.bf16 %v156_v28, %v156_v28 }
  0xb5   :  { %185 = vst.msk [vmem:[%s395_s3 + $0x2c] sm:$0xf] %vm173_vm2, %v168_v29 }
  0xb6   :  { %189 = vst.msk [vmem:[%s395_s3 + $0x3c] sm:$0xf] %vm173_vm2, %v172_v31 }

// kernel: discriminator_forward.5
= control target key start
LH: loop header
LB: loop body
LE: loop exit
PB: predicated region body
PF: predicated region fallthrough
CT: control target
= control target key end

     0   :  { %s886_s18 = smov 0   ;;  %s967_s0 = inlined_call_operand.vmem [shape: bf16[2,4096], index: 0, kind: input, shape index: {}]   ;;  %s968_s1 = inlined_call_operand.vmem [shape: bf16[4096,32], index: 1, kind: input, shape index: {}]   ;;  %s969_s2 = inlined_call_operand.vmem [shape: f32[1,32], index: 2, kind: input, shape index: {}]   ;;  %s970_s3 = inlined_call_operand.vmem [shape: f32[1,32], index: 3, kind: input, shape index: {}]   ;;  %s971_s4 = inlined_call_operand.vmem [shape: f32[1,32], index: 4, kind: input, shape index: {}]   ;;  %s972_s5 = inlined_call_operand.vmem [shape: f32[2,32], index: 5, kind: output, shape index: {}]  }
   0x1 LB: > { %s892_s19 = sadd.s32 4294967295, %s852_s18   ;;  %p661_p0 = scmp.ge.s32.totalorder %s852_s18, 1  ;;  %s852_s18 = sphi %s886_s18, %s15_s18  }
   0x2   : > { %p193_p1 = scmp.lt.s32.totalorder %s852_s18, 9 }
   0x4   : > { %p194_p2 = pnand %p661_p0, %p193_p1 }
   0x5   : > { %s662_s20 = sshll.u32 (!%p194_p2), %s892_s19, 2  ;;  %s663_s21 = sshll.u32 (!%p194_p2), %s892_s19, 6 }
   0x6   : > { %197 = sbr.rel (%p194_p2) target bundleno = 266 (0x10a), region = 40  ;;  %p221_p3 = scmp.lt.s32.totalorder (!%p194_p2), %s662_s20, 31 }
   0x7   : > { %p226_p4 = scmp.lt.s32.totalorder (!%p194_p2), %s663_s21, 511  ;;  %p665_p5 = scmp.ne.s32.totalorder (!%p194_p2), %s892_s19, 0 }
   0xb   : > { %s974_s20 = smov (!%p221_p3, %s662_s20), 31  ;;  %s976_s21 = smov (!%p226_p4, %s663_s21), 511 }
   0xc   : > { %s223_s24 = scalar_lea.vmem %s967_s0, %s974_s20  ;;  %s664_s25 = sshll.u32 %s976_s21, 2 }
   0xd   : > { %s907_s28 = scalar_lea.vmem %s968_s1, %s664_s25  ;;  %234 = sbr.rel (%p665_p5) target bundleno = 20 (0x14), region = 44 }
  0x12   : > { %vm235_vm0 = vcmask 254976   ;;  %v854_v0 = vmov 0.0  }
  0x13   : > { %236 = vst.msk [vmem:[#allocation2] sm:$0x3] %vm235_vm0, %v854_v0 }
  0x14 PF: > { %v804_v1 = vld [vmem:[%s907_s28 + $0x38] sm:$0xff]  ;;  %v803_v5 = vld [vmem:[%s907_s28 + $0x30] sm:$0xff]  ;;  %v802_v9 = vld [vmem:[%s907_s28 + $0x28] sm:$0xff]  ;;  %vm558_vm1 = vcmask 254976   ;;  %p794_p6 = scmp.ne.s32.totalorder %s892_s19, 7 }
  0x15   : > { %v812_v2 = vld [vmem:[%s907_s28 + $0x78] sm:$0xff]  ;;  %505 = vmatpush.bf16.msra.mxu0 %v804_v1  ;;  %v811_v6 = vld [vmem:[%s907_s28 + $0x70] sm:$0xff]  ;;  %v810_v10 = vld [vmem:[%s907_s28 + $0x68] sm:$0xff] }
  0x16   : > { %v820_v3 = vld [vmem:[%s907_s28 + $0xb8] sm:$0xff]  ;;  %518 = vmatpush.bf16.msra.mxu1 %v812_v2  ;;  %v819_v7 = vld [vmem:[%s907_s28 + $0xb0] sm:$0xff]  ;;  %v818_v11 = vld [vmem:[%s907_s28 + $0xa8] sm:$0xff] }
  0x17   : > { %v828_v4 = vld [vmem:[%s907_s28 + $0xf8] sm:$0xff]  ;;  %531 = vmatpush.bf16.msra.mxu2 %v820_v3  ;;  %v827_v8 = vld [vmem:[%s907_s28 + $0xf0] sm:$0xff]  ;;  %v826_v12 = vld [vmem:[%s907_s28 + $0xe8] sm:$0xff] }
  0x18   : > { %544 = vmatpush.bf16.msra.mxu3 %v828_v4  ;;  %v801_v13 = vld [vmem:[%s907_s28 + $0x20] sm:$0xff]  ;;  %v800_v18 = vld [vmem:[%s907_s28 + $0x18] sm:$0xff]  ;;  %v799_v22 = vld [vmem:[%s907_s28 + $0x10] sm:$0xff] }
  0x19   : > { %506 = vmatpush.bf16.msra.mxu0 %v803_v5  ;;  %v809_v14 = vld [vmem:[%s907_s28 + $0x60] sm:$0xff]  ;;  %v808_v19 = vld [vmem:[%s907_s28 + $0x58] sm:$0xff]  ;;  %v807_v23 = vld [vmem:[%s907_s28 + $0x50] sm:$0xff] }
  0x1a   : > { %519 = vmatpush.bf16.msra.mxu1 %v811_v6  ;;  %v238_v15 = vld [vmem:[%s223_s24] sm:$0xf]  ;;  %v816_v20 = vld [vmem:[%s907_s28 + $0x98] sm:$0xff]  ;;  %v815_v24 = vld [vmem:[%s907_s28 + $0x90] sm:$0xff] }
  0x1b   : > { %532 = vmatpush.bf16.msra.mxu2 %v819_v7  ;;  %v817_v16 = vld [vmem:[%s907_s28 + $0xa0] sm:$0xff]  ;;  %304 = vst [vmem:[#allocation1] ss:$9 sm:$0xff] %v238_v15  ;;  %v824_v21 = vld [vmem:[%s907_s28 + $0xd8] sm:$0xff]  ;;  %v823_v25 = vld [vmem:[%s907_s28 + $0xd0] sm:$0xff] }
  0x1c   : > { %545 = vmatpush.bf16.msra.mxu3 %v827_v8  ;;  %v825_v17 = vld [vmem:[%s907_s28 + $0xe0] sm:$0xff]  ;;  %v798_v26 = vld [vmem:[%s907_s28 + $0x8] sm:$0xff] }
  0x1d   : > { %507 = vmatpush.bf16.msra.mxu0 %v802_v9  ;;  %v806_v27 = vld [vmem:[%s907_s28 + $0x48] sm:$0xff]  ;;  %v797_v30 = vld [vmem:[%s907_s28] sm:$0xff] }
  0x1e   : > { %520 = vmatpush.bf16.msra.mxu1 %v810_v10  ;;  %v814_v28 = vld [vmem:[%s907_s28 + $0x88] sm:$0xff]  ;;  %v805_v31 = vld [vmem:[%s907_s28 + $0x40] sm:$0xff] }
  0x1f   : > { %533 = vmatpush.bf16.msra.mxu2 %v818_v11  ;;  %v822_v29 = vld [vmem:[%s907_s28 + $0xc8] sm:$0xff]  ;;  %v813_v32 = vld [vmem:[%s907_s28 + $0x80] sm:$0xff] }
  0x20   : > { %546 = vmatpush.bf16.msra.mxu3 %v826_v12  ;;  %v821_v33 = vld [vmem:[%s907_s28 + $0xc0] sm:$0xff]  ;;  %v237_v46 = vld [vmem:[#allocation2] sm:$0x3] }
  0x21   : > { %508 = vmatpush.bf16.msra.mxu0 %v801_v13 }
  0x22   : > { %521 = vmatpush.bf16.msra.mxu1 %v809_v14  ;;  %v305_v34 = vld [vmem:[#allocation1] sm:$0xff]  ;;  %v306_v35 = vld [vmem:[#allocation1 + $0x9] sm:$0xff]  ;;  %v307_v36 = vld [vmem:[#allocation1 + $0x12] sm:$0xff] }
  0x23   : > { %534 = vmatpush.bf16.msra.mxu2 %v817_v16  ;;  %v308_v37 = vld [vmem:[#allocation1 + $0x1b] sm:$0xff] }
  0x24   : > { %547 = vmatpush.bf16.msra.mxu3 %v825_v17 }
  0x25   : > { %509 = vmatpush.bf16.msra.mxu0 %v800_v18 }
  0x26   : > { %522 = vmatpush.bf16.msra.mxu1 %v808_v19 }
  0x27   : > { %535 = vmatpush.bf16.msra.mxu2 %v816_v20 }
  0x28   : > { %548 = vmatpush.bf16.msra.mxu3 %v824_v21 }
  0x29   : > { %510 = vmatpush.bf16.msra.mxu0 %v799_v22 }
  0x2a   : > { %523 = vmatpush.bf16.msra.mxu1 %v807_v23 }
  0x2b   : > { %536 = vmatpush.bf16.msra.mxu2 %v815_v24 }
  0x2c   : > { %549 = vmatpush.bf16.msra.mxu3 %v823_v25 }
  0x2d   : > { %511 = vmatpush.bf16.msra.mxu0 %v798_v26 }
  0x2e   : > { %524 = vmatpush.bf16.msra.mxu1 %v806_v27 }
  0x2f   : > { %537 = vmatpush.bf16.msra.mxu2 %v814_v28 }
  0x30   : > { %550 = vmatpush.bf16.msra.mxu3 %v822_v29 }
  0x31   : > { %512 = vmatpush.bf16.msra.mxu0 %v797_v30 }
  0x32   : > { %525 = vmatpush.bf16.msra.mxu1 %v805_v31 }
  0x33   : > { %538 = vmatpush.bf16.msra.mxu2 %v813_v32 }
  0x34   : > { %551 = vmatpush.bf16.msra.mxu3 %v821_v33  ;;  %513 = vmatmul.bf16.vlgmr.msra.gmra.mxu0 %v305_v34 }
  0x35   : > { %526 = vmatmul.bf16.vlgmr.msra.gmra.mxu1 %v306_v35 }
  0x36   : > { %539 = vmatmul.bf16.vlgmr.msra.gmra.mxu2 %v307_v36 }
  0x37   : > { %552 = vmatmul.bf16.vlgmr.msra.gmra.mxu3 %v308_v37 }
  0xb1   : > { %v514_v38 = vpop.f32.mrf.mxu0 }
  0xb2   : > { %v527_v39 = vpop.f32.mrf.mxu1 }
  0xb3   : > { %v528_v40 = vadd.f32 %v527_v39, %v514_v38 }
  0xb9   : > { %v540_v41 = vpop.f32.mrf.mxu2  ;;  %v516_v44 = vpop.f32.mrf.mxu0 }
  0xba   : > { %v553_v42 = vpop.f32.mrf.mxu3  ;;  %v541_v43 = vadd.f32 %v540_v41, %v528_v40  ;;  %v529_v45 = vpop.f32.mrf.mxu1 }
  0xbc   : > { %v554_v47 = vadd.f32 %v553_v42, %v541_v43 }
  0xbe   : > { %v557_v48 = vadd.f32 %v554_v47, %v237_v46  ;;  %563 = sbr.rel (%p794_p6) target bundleno = 266 (0x10a), region = 48 }
  0xc0   : > { %559 = vst.msk [vmem:[#allocation2] sm:$0x3] %vm558_vm1, %v557_v48 }
  0xc1   : > { %v542_v49 = vpop.f32.mrf.mxu2 }
  0xc2   : > { %v555_v50 = vpop.f32.mrf.mxu3 }
  0xc3   : > { %v839_v52 = vld [vmem:[%s969_s2] ss:$0 sm:$0xff]  ;;  %v855_v54 = vmov 2.0  }
  0xc4   : > { %842 = vrcp.f32 %v855_v54  ;;  %v840_v22 = vld [vmem:[%s970_s3] ss:$0 sm:$0xff] }
  0xc5   : > { %v841_v25 = vld [vmem:[%s971_s4] ss:$0 sm:$0xff] }
  0xc7   : > { %v564_v51 = vld [vmem:[#allocation2] sm:$0x3] }
  0xc8   : > { %v569_v53 = vadd.f32 %v839_v52, %v564_v51 }
  0xca   : > { %v570_v55 = vsel %vm558_vm1, %v569_v53, 0.0  ;;  %v843_v58 = vpop.eup %842 }
  0xcb   : > { %v571_v56 = vrot.slane %v570_v55, 4  ;;  %v578_v60 = vmul.f32 2.0, %v843_v58  ;;  %vm582_vm2 = vweird.f32 %v843_v58 }
  0xcd   : > { %v572_v57 = vadd.f32 %v571_v56, %v570_v55  ;;  %v579_v62 = vsub.f32 1.0, %v578_v60 }
  0xcf   : > { %v573_v59 = vrot.slane %v572_v57, 2  ;;  %v580_v0 = vmul.f32 %v843_v58, %v579_v62 }
  0xd1   : > { %v574_v61 = vadd.f32 %v573_v59, %v572_v57  ;;  %v581_v2 = vadd.f32 %v843_v58, %v580_v0 }
  0xd3   : > { %v575_v63 = vrot.slane %v574_v61, 1  ;;  %v583_v3 = vsel %vm582_vm2, %v843_v58, %v581_v2 }
  0xd5   : > { %v576_v1 = vadd.f32 %v575_v63, %v574_v61 }
  0xd7   : > { %v584_v4 = vmul.f32 %v583_v3, %v576_v1 }
  0xd9   : > { %v585_v5 = vsub.f32 %v569_v53, %v584_v4 }
  0xdb   : > { %v586_v6 = vmul.f32 %v585_v5, %v585_v5 }
  0xdd   : > { %v587_v7 = vsel %vm558_vm1, %v586_v6, 0.0 }
  0xde   : > { %v588_v8 = vrot.slane %v587_v7, 4 }
  0xe0   : > { %v589_v9 = vadd.f32 %v588_v8, %v587_v7 }
  0xe2   : > { %v590_v10 = vrot.slane %v589_v9, 2 }
  0xe4   : > { %v591_v11 = vadd.f32 %v590_v10, %v589_v9 }
  0xe6   : > { %v592_v12 = vrot.slane %v591_v11, 1 }
  0xe8   : > { %v593_v13 = vadd.f32 %v592_v12, %v591_v11 }
  0xea   : > { %v594_v14 = vmul.f32 %v593_v13, %v583_v3 }
  0xec   : > { %v595_v15 = vadd.f32 0.8, %v594_v14 }
  0xee   : > { %844 = vrsqrt.f32 %v595_v15  ;;  %vm602_vm3 = vweird.f32 %v595_v15 }
  0xf4   : > { %v845_v16 = vpop.eup %844 }
  0xf5   : > { %v597_v17 = vmul.f32 %v845_v16, %v595_v15  ;;  %vm603_vm4 = vweird.f32 %v845_v16 }
  0xf6   : > { %vm604_vm5 = vmor %vm602_vm3, %vm603_vm4 }
  0xf7   : > { %v598_v18 = vmul.f32 %v845_v16, %v597_v17 }
  0xf9   : > { %v599_v19 = vmul.f32 0.5, %v598_v18 }
  0xfb   : > { %v600_v20 = vsub.f32 1.5, %v599_v19 }
  0xfd   : > { %v601_v21 = vmul.f32 %v845_v16, %v600_v20 }
  0xff   : > { %v605_v23 = vsel %vm604_vm5, %v845_v16, %v601_v21 }
 0x100   : > { %v606_v24 = vmul.f32 %v605_v23, %v585_v5 }
 0x102   : > { %v611_v26 = vmul.f32 %v840_v22, %v606_v24 }
 0x104   : > { %v616_v27 = vadd.f32 %v841_v25, %v611_v26 }
 0x106   : > { %vm617_vm6 = vcmp.gt.f32.partialorder %v616_v27, 0.0  ;;  %v618_v28 = vmul.f32 0.2, %v616_v27 }
 0x108   : > { %v619_v29 = vsel %vm617_vm6, %v616_v27, %v618_v28 }
 0x109   : > { %620 = vst.msk [vmem:[%s972_s5] sm:$0x3] %vm558_vm1, %v619_v29 }
 0x10a PF: > { %s15_s18 = sadd.s32 1, %s852_s18  }
 0x10b   : > { %p12_p7 = scmp.ge.s32.totalorder %s15_s18, 10  }
 0x10d   :  { %14 = sbr.rel (!%p12_p7) target bundleno = 1 (0x1), region = 77 }

// kernel: discriminator_forward.6
= control target key start
LH: loop header
LB: loop body
LE: loop exit
PB: predicated region body
PF: predicated region fallthrough
CT: control target
= control target key end

     0   :  { %s852_s18 = smov 0   ;;  %s854_s19 = smov 0   ;;  %s961_s0 = inlined_call_operand.vmem [shape: f32[2,32], index: 0, kind: input, shape index: {}]   ;;  %s962_s1 = inlined_call_operand.vmem [shape: bf16[32,4096], index: 1, kind: input, shape index: {}]   ;;  %s963_s2 = inlined_call_operand.vmem [shape: f32[1,4096], index: 2, kind: input, shape index: {}]   ;;  %s964_s3 = inlined_call_operand.vmem [shape: f32[1,4096], index: 3, kind: input, shape index: {}]   ;;  %s965_s4 = inlined_call_operand.vmem [shape: f32[1,4096], index: 4, kind: input, shape index: {}]   ;;  %s966_s5 = inlined_call_operand.vmem [shape: bf16[2,4096], index: 5, kind: output, shape index: {}]  }
   0x1   :  { %s856_s20 = smov 0  }
   0x2 LB: > { %s702_s21 = sadd.s32 4294967295, %s819_s20   ;;  %s869_s22 = sadd.s32 1, %s819_s20   ;;  %s819_s20 = sphi %s856_s20, %s969_s20   ;;  %s815_s19 = sphi %s854_s19, %s968_s19   ;;  %s811_s18 = sphi %s852_s18, %s967_s18  }
   0x3   : > { %s40_s23 = ssub.s32 %s819_s20, %s869_s22  ;;  %s43_s24 = sadd.s32 1, %s815_s19 }
   0x4   : > { %p41_p0 = scmp.eq.s32.totalorder %s40_s23, 0  ;;  %p50_p1 = scmp.ne.s32.totalorder %s815_s19, %s811_s18 }
   0x5   : > { %p51_p2 = scmp.eq.s32.totalorder %s819_s20, 0  ;;  %p705_p4 = scmp.ge.s32.totalorder %s819_s20, 8 }
   0x6   : > { %s878_s25 = scalar_select %p41_p0, %s815_s19, %s43_s24  }
   0x7   : > { %p52_p3 = por %p51_p2, %p50_p1  ;;  %183 = sbr.rel (%p705_p4) target bundleno = 24 (0x18), region = 20 }
   0xc   : > { %186 = sbr.rel (!%p52_p3) target bundleno = 24 (0x18), region = 24  ;;  %s188_s26 = sand.u32 (%p52_p3), 1, %s815_s19  }
   0xd   : > { %s753_s27 = sshll.u32 (%p52_p3), %s819_s20, 4  ;;  %s706_s28 = sshll.u32 (%p52_p3), %s188_s26, 6 }
   0xe   : > { %s193_s6 = scalar_lea.vmem (%p52_p3), %s962_s1, %s753_s27  ;;  %s190_s7 = scalar_lea.vmem (%p52_p3), [#allocation2], %s706_s28 }
   0xf   : > { %v206_v0 = vld [vmem:[%s193_s6] sm:$0xff] (%p52_p3)  ;;  %v208_v1 = vld [vmem:[%s193_s6 + $0x8] sm:$0xff] (%p52_p3) }
  0x10   : > { %v210_v2 = vld [vmem:[%s193_s6 + $0x80] sm:$0xff] (%p52_p3)  ;;  %207 = vst [vmem:[%s190_s7] sm:$0xff] (%p52_p3), %v206_v0  ;;  %v212_v3 = vld [vmem:[%s193_s6 + $0x88] sm:$0xff] (%p52_p3) }
  0x11   : > { %209 = vst [vmem:[%s190_s7 + $0x8] sm:$0xff] %v208_v1  ;;  %v214_v4 = vld [vmem:[%s193_s6 + $0x100] sm:$0xff]  ;;  %v216_v5 = vld [vmem:[%s193_s6 + $0x108] sm:$0xff] }
  0x12   : > { %211 = vst [vmem:[%s190_s7 + $0x10] sm:$0xff] %v210_v2  ;;  %v218_v6 = vld [vmem:[%s193_s6 + $0x180] sm:$0xff]  ;;  %v220_v7 = vld [vmem:[%s193_s6 + $0x188] sm:$0xff] }
  0x13   : > { %213 = vst [vmem:[%s190_s7 + $0x18] sm:$0xff] %v212_v3 }
  0x14   : > { %215 = vst [vmem:[%s190_s7 + $0x20] sm:$0xff] %v214_v4 }
  0x15   : > { %217 = vst [vmem:[%s190_s7 + $0x28] sm:$0xff] %v216_v5 }
  0x16   : > { %219 = vst [vmem:[%s190_s7 + $0x30] sm:$0xff] %v218_v6 }
  0x17   : > { %221 = vst [vmem:[%s190_s7 + $0x38] sm:$0xff] %v220_v7 }
  0x18 PF: > { %p709_p5 = scmp.ge.s32.totalorder %s819_s20, 1  ;;  %p250_p6 = scmp.lt.s32.totalorder %s819_s20, 9 }
  0x1a   : > { %p251_p7 = pnand %p709_p5, %p250_p6 }
  0x1b   : > { %s257_s8 = sand.u32 (!%p251_p7), 1, %s811_s18   ;;  %s711_s13 = sshll.u32 (!%p251_p7), %s702_s21, 2 }
  0x1c   : > { %254 = sbr.rel (%p251_p7) target bundleno = 249 (0xf9), region = 59  ;;  %s710_s9 = sshll.u32 (!%p251_p7), %s257_s8, 6 }
  0x1d   : > { %s259_s10 = scalar_lea.vmem (!%p251_p7), [#allocation2], %s710_s9  ;;  %p297_p8 = scmp.lt.s32.totalorder (!%p251_p7), %s711_s13, 31 }
  0x21   : > { %v733_v8 = vld [vmem:[%s259_s10 + $0x20] sm:$0xf]  ;;  %v760_v9 = vld [vmem:[%s259_s10 + $0x2c] sm:$0xf0]  ;;  %v758_v10 = vld [vmem:[%s259_s10 + $0x24] sm:$0xf] }
  0x22   : > { %v734_v11 = vor.u32 %v760_v9, %v733_v8  ;;  %v735_v12 = vld [vmem:[%s259_s10 + $0x30] sm:$0xf0]  ;;  %v741_v13 = vld [vmem:[%s259_s10 + $0x28] sm:$0xf]  ;;  %v761_v14 = vld [vmem:[%s259_s10 + $0x34] sm:$0xf0] }
  0x23   : > { %v317_v15 = vld [vmem:[%s961_s0] sm:$0x3]  ;;  %v738_v16 = vor.u32 %v758_v10, %v735_v12  ;;  %v742_v17 = vor.u32 %v761_v14, %v741_v13  ;;  %v759_v18 = vld [vmem:[%s259_s10 + $0x2c] sm:$0xf]  ;;  %v743_v19 = vld [vmem:[%s259_s10 + $0x38] sm:$0xf0] }
  0x24   : > { %v717_v20 = vld [vmem:[%s259_s10] sm:$0xf]  ;;  %387 = vmatpush.bf16.msra.mxu0 %v734_v11  ;;  %v746_v21 = vor.u32 %v759_v18, %v743_v19  ;;  %v756_v22 = vld [vmem:[%s259_s10 + $0xc] sm:$0xf0]  ;;  %v754_v23 = vld [vmem:[%s259_s10 + $0x4] sm:$0xf]  ;;  %v318_v33 = vpack.c.bf16 %v317_v15, %v317_v15 }
  0x25   : > { %v719_v24 = vld [vmem:[%s259_s10 + $0x10] sm:$0xf0]  ;;  %400 = vmatpush.bf16.msra.mxu1 %v738_v16  ;;  %413 = vmatpush.bf16.msra.mxu2 %v742_v17  ;;  %v718_v25 = vor.u32 %v756_v22, %v717_v20  ;;  %v725_v27 = vld [vmem:[%s259_s10 + $0x8] sm:$0xf]  ;;  %v757_v28 = vld [vmem:[%s259_s10 + $0x14] sm:$0xf0] }
  0x26   : > { %v722_v26 = vor.u32 %v754_v23, %v719_v24  ;;  %v755_v29 = vld [vmem:[%s259_s10 + $0xc] sm:$0xf]  ;;  %426 = vmatpush.bf16.msra.mxu3 %v746_v21  ;;  %v726_v30 = vor.u32 %v757_v28, %v725_v27  ;;  %v727_v31 = vld [vmem:[%s259_s10 + $0x18] sm:$0xf0]  ;;  %vm377_vm0 = vcmask 261120   ;;  %s971_s13 = smov (!%p297_p8, %s711_s13), 31 }
  0x27   : > { %v730_v32 = vor.u32 %v755_v29, %v727_v31  ;;  %v821_v34 = vmov 2.0   ;;  %s299_s16 = scalar_lea.vmem %s963_s2, %s971_s13  ;;  %vm433_vm1 = vcmask 1041408   ;;  %s304_s20 = scalar_lea.vmem %s964_s3, %s971_s13 }
  0x28   : > { %388 = vmatpush.bf16.msra.mxu0 %v718_v25  ;;  %787 = vrcp.f32 %v821_v34  ;;  %v327_v36 = vld [vmem:[%s299_s16] sm:$0xf]  ;;  %s309_s24 = scalar_lea.vmem %s965_s4, %s971_s13  ;;  %s314_s28 = scalar_lea.vmem %s966_s5, %s971_s13 }
  0x29   : > { %401 = vmatpush.bf16.msra.mxu1 %v722_v26  ;;  %414 = vmatpush.bf16.msra.mxu2 %v726_v30  ;;  %v329_v37 = vperm.slane %v327_v36, 0  ;;  %v330_v39 = vperm.slane %v327_v36, 1  ;;  %v331_v48 = vperm.slane %v327_v36, 2  ;;  %v332_v51 = vperm.slane %v327_v36, 3 }
  0x2a   : > { %427 = vmatpush.bf16.msra.mxu3 %v730_v32 }
  0x2b   : > { %747 = vmatmul.msk.bf16.vlgmr.msra.gmra.mxu0 %vm377_vm0, %v318_v33 }
  0x2c   : > { %748 = vmatmul.msk.bf16.vlgmr.msra.gmra.mxu1 %vm377_vm0, %v318_v33  ;;  %749 = vmatmul.msk.bf16.vlgmr.msra.gmra.mxu2 %vm377_vm0, %v318_v33 }
  0x2d   : > { %750 = vmatmul.msk.bf16.vlgmr.msra.gmra.mxu3 %vm377_vm0, %v318_v33 }
  0x2e   : > { %v788_v35 = vpop.eup %787 }
  0x2f   : > { %v463_v38 = vmul.f32 2.0, %v788_v35  ;;  %vm467_vm2 = vweird.f32 %v788_v35 }
  0x31   : > { %v464_v42 = vsub.f32 1.0, %v463_v38 }
  0x33   : > { %v465_v49 = vmul.f32 %v788_v35, %v464_v42 }
  0x35   : > { %v466_v59 = vadd.f32 %v788_v35, %v465_v49 }
  0x37   : > { %v904_v6 = vsel %vm467_vm2, %v788_v35, %v466_v59 }
  0xa8   : > { %v390_v40 = vpop.f32.mrf.mxu0 }
  0xa9   : > { %v391_v41 = vadd.f32 %v390_v40, %v329_v37  ;;  %v403_v43 = vpop.f32.mrf.mxu1 }
  0xaa   : > { %v404_v44 = vadd.f32 %v403_v43, %v330_v39 }
  0xab   : > { %v434_v45 = vsel %vm433_vm1, %v391_v41, 0.0 }
  0xac   : > { %v435_v46 = vrot.slane %v434_v45, 4  ;;  %v441_v47 = vsel %vm433_vm1, %v404_v44, 0.0 }
  0xad   : > { %v442_v50 = vrot.slane %v441_v47, 4 }
  0xae   : > { %v436_v52 = vadd.f32 %v435_v46, %v434_v45 }
  0xaf   : > { %v443_v53 = vadd.f32 %v442_v50, %v441_v47  ;;  %v416_v54 = vpop.f32.mrf.mxu2 }
  0xb0   : > { %v437_v55 = vrot.slane %v436_v52, 2  ;;  %v417_v56 = vadd.f32 %v416_v54, %v331_v48  ;;  %v429_v57 = vpop.f32.mrf.mxu3  ;;  %v392_v58 = vpop.f32.mrf.mxu0 }
  0xb1   : > { %v444_v60 = vrot.slane %v443_v53, 2  ;;  %v430_v61 = vadd.f32 %v429_v57, %v332_v51  ;;  %v405_v62 = vpop.f32.mrf.mxu1 }
  0xb2   : > { %v438_v63 = vadd.f32 %v437_v55, %v436_v52  ;;  %v448_v0 = vsel %vm433_vm1, %v417_v56, 0.0 }
  0xb3   : > { %v445_v1 = vadd.f32 %v444_v60, %v443_v53  ;;  %v449_v2 = vrot.slane %v448_v0, 4  ;;  %v455_v3 = vsel %vm433_vm1, %v430_v61, 0.0 }
  0xb4   : > { %v439_v4 = vrot.slane %v438_v63, 1  ;;  %v456_v5 = vrot.slane %v455_v3, 4 }
  0xb5   : > { %v446_v7 = vrot.slane %v445_v1, 1  ;;  %v450_v8 = vadd.f32 %v449_v2, %v448_v0 }
  0xb6   : > { %v440_v9 = vadd.f32 %v439_v4, %v438_v63  ;;  %v457_v10 = vadd.f32 %v456_v5, %v455_v3 }
  0xb7   : > { %v447_v11 = vadd.f32 %v446_v7, %v445_v1  ;;  %v451_v12 = vrot.slane %v450_v8, 2  ;;  %v418_v13 = vpop.f32.mrf.mxu2 }
  0xb8   : > { %v469_v14 = vmul.f32 %v904_v6, %v440_v9  ;;  %v458_v15 = vrot.slane %v457_v10, 2  ;;  %v431_v16 = vpop.f32.mrf.mxu3 }
  0xb9   : > { %v470_v17 = vmul.f32 %v904_v6, %v447_v11  ;;  %v452_v18 = vadd.f32 %v451_v12, %v450_v8  ;;  %v561_v16 = vld [vmem:[%s304_s20] sm:$0xf] }
  0xba   : > { %v908_v19 = vsub.f32 %v391_v41, %v469_v14  ;;  %v459_v20 = vadd.f32 %v458_v15, %v457_v10 }
  0xbb   : > { %v910_v21 = vsub.f32 %v404_v44, %v470_v17  ;;  %v453_v22 = vrot.slane %v452_v18, 1 }
  0xbc   : > { %v477_v23 = vmul.f32 %v908_v19, %v908_v19  ;;  %v460_v24 = vrot.slane %v459_v20, 1 }
  0xbd   : > { %v478_v25 = vmul.f32 %v910_v21, %v910_v21  ;;  %v454_v26 = vadd.f32 %v453_v22, %v452_v18 }
  0xbe   : > { %v481_v27 = vsel %vm433_vm1, %v477_v23, 0.0  ;;  %v461_v28 = vadd.f32 %v460_v24, %v459_v20  ;;  %v575_v23 = vld [vmem:[%s309_s24] sm:$0xf] }
  0xbf   : > { %v482_v29 = vrot.slane %v481_v27, 4  ;;  %v488_v30 = vsel %vm433_vm1, %v478_v25, 0.0  ;;  %v471_v31 = vmul.f32 %v904_v6, %v454_v26  ;;  %v563_v25 = vperm.slane %v561_v16, 0 }
  0xc0   : > { %v489_v32 = vrot.slane %v488_v30, 4  ;;  %v472_v33 = vmul.f32 %v904_v6, %v461_v28 }
  0xc1   : > { %v483_v34 = vadd.f32 %v482_v29, %v481_v27  ;;  %v920_v35 = vsub.f32 %v417_v56, %v471_v31  ;;  %v564_v29 = vperm.slane %v561_v16, 1 }
  0xc2   : > { %v490_v36 = vadd.f32 %v489_v32, %v488_v30  ;;  %v922_v37 = vsub.f32 %v430_v61, %v472_v33  ;;  %v577_v32 = vperm.slane %v575_v23, 0 }
  0xc3   : > { %v484_v38 = vrot.slane %v483_v34, 2  ;;  %v479_v39 = vmul.f32 %v920_v35, %v920_v35 }
  0xc4   : > { %v491_v40 = vrot.slane %v490_v36, 2  ;;  %v480_v41 = vmul.f32 %v922_v37, %v922_v37 }
  0xc5   : > { %v485_v42 = vadd.f32 %v484_v38, %v483_v34  ;;  %v495_v43 = vsel %vm433_vm1, %v479_v39, 0.0  ;;  %v578_v38 = vperm.slane %v575_v23, 1 }
  0xc6   : > { %v492_v44 = vadd.f32 %v491_v40, %v490_v36  ;;  %v496_v45 = vrot.slane %v495_v43, 4  ;;  %v502_v46 = vsel %vm433_vm1, %v480_v41, 0.0 }
  0xc7   : > { %v486_v47 = vrot.slane %v485_v42, 1  ;;  %v503_v48 = vrot.slane %v502_v46, 4 }
  0xc8   : > { %v493_v49 = vrot.slane %v492_v44, 1  ;;  %v497_v50 = vadd.f32 %v496_v45, %v495_v43 }
  0xc9   : > { %v487_v51 = vadd.f32 %v486_v47, %v485_v42  ;;  %v504_v52 = vadd.f32 %v503_v48, %v502_v46  ;;  %v565_v46 = vperm.slane %v561_v16, 2  ;;  %v566_v48 = vperm.slane %v561_v16, 3 }
  0xca   : > { %v494_v53 = vadd.f32 %v493_v49, %v492_v44  ;;  %v498_v54 = vrot.slane %v497_v50, 2 }
  0xcb   : > { %v509_v55 = vmul.f32 %v487_v51, %v904_v6  ;;  %v505_v56 = vrot.slane %v504_v52, 2 }
  0xcc   : > { %v510_v57 = vmul.f32 %v494_v53, %v904_v6  ;;  %v499_v58 = vadd.f32 %v498_v54, %v497_v50  ;;  %v579_v50 = vperm.slane %v575_v23, 2 }
  0xcd   : > { %v513_v59 = vadd.f32 1e-05, %v509_v55  ;;  %v506_v60 = vadd.f32 %v505_v56, %v504_v52  ;;  %v580_v55 = vperm.slane %v575_v23, 3 }
  0xce   : > { %v514_v61 = vadd.f32 1e-05, %v510_v57  ;;  %v500_v62 = vrot.slane %v499_v58, 1 }
  0xcf   : > { %789 = vrsqrt.f32 %v513_v59  ;;  %v507_v63 = vrot.slane %v506_v60, 1  ;;  %vm523_vm5 = vweird.f32 %v513_v59 }
  0xd0   : > { %791 = vrsqrt.f32 %v514_v61  ;;  %v501_v0 = vadd.f32 %v500_v62, %v499_v58  ;;  %vm533_vm7 = vweird.f32 %v514_v61 }
  0xd1   : > { %v508_v1 = vadd.f32 %v507_v63, %v506_v60 }
  0xd2   : > { %v511_v2 = vmul.f32 %v501_v0, %v904_v6 }
  0xd3   : > { %v512_v3 = vmul.f32 %v508_v1, %v904_v6 }
  0xd4   : > { %v515_v4 = vadd.f32 1e-05, %v511_v2 }
  0xd5   : > { %v790_v5 = vpop.eup %789  ;;  %v516_v7 = vadd.f32 1e-05, %v512_v3 }
  0xd6   : > { %v792_v8 = vpop.eup %791  ;;  %v518_v9 = vmul.f32 %v790_v5, %v513_v59  ;;  %793 = vrsqrt.f32 %v515_v4  ;;  %vm524_vm3 = vweird.f32 %v790_v5  ;;  %vm543_vm11 = vweird.f32 %v515_v4 }
  0xd7   : > { %v528_v10 = vmul.f32 %v792_v8, %v514_v61  ;;  %795 = vrsqrt.f32 %v516_v7  ;;  %vm534_vm4 = vweird.f32 %v792_v8  ;;  %vm525_vm6 = vmor %vm523_vm5, %vm524_vm3  ;;  %vm553_vm13 = vweird.f32 %v516_v7 }
  0xd8   : > { %v519_v11 = vmul.f32 %v790_v5, %v518_v9  ;;  %vm535_vm8 = vmor %vm533_vm7, %vm534_vm4  ;;  %vm608_vm4 = vcmask 1040384   ;;  %vm612_vm5 = vcmask 1042434  }
  0xd9   : > { %v529_v12 = vmul.f32 %v792_v8, %v528_v10 }
  0xda   : > { %v520_v13 = vmul.f32 0.5, %v519_v11 }
  0xdb   : > { %v530_v6 = vmul.f32 0.5, %v529_v12 }
  0xdc   : > { %v794_v14 = vpop.eup %793  ;;  %v521_v15 = vsub.f32 1.5, %v520_v13 }
  0xdd   : > { %v796_v17 = vpop.eup %795  ;;  %v531_v18 = vsub.f32 1.5, %v530_v6  ;;  %v538_v20 = vmul.f32 %v794_v14, %v515_v4  ;;  %vm544_vm9 = vweird.f32 %v794_v14 }
  0xde   : > { %v522_v22 = vmul.f32 %v790_v5, %v521_v15  ;;  %v548_v24 = vmul.f32 %v796_v17, %v516_v7  ;;  %vm554_vm10 = vweird.f32 %v796_v17  ;;  %vm545_vm12 = vmor %vm543_vm11, %vm544_vm9 }
  0xdf   : > { %v532_v26 = vmul.f32 %v792_v8, %v531_v18  ;;  %v539_v27 = vmul.f32 %v794_v14, %v538_v20  ;;  %vm555_vm15 = vmor %vm553_vm13, %vm554_vm10 }
  0xe0   : > { %v526_v28 = vsel %vm525_vm6, %v790_v5, %v522_v22  ;;  %v549_v30 = vmul.f32 %v796_v17, %v548_v24 }
  0xe1   : > { %v557_v31 = vmul.f32 %v526_v28, %v908_v19  ;;  %v536_v33 = vsel %vm535_vm8, %v792_v8, %v532_v26  ;;  %v540_v34 = vmul.f32 0.5, %v539_v27 }
  0xe2   : > { %v558_v36 = vmul.f32 %v536_v33, %v910_v21  ;;  %v550_v39 = vmul.f32 0.5, %v549_v30 }
  0xe3   : > { %v571_v40 = vmul.f32 %v563_v25, %v557_v31  ;;  %v541_v41 = vsub.f32 1.5, %v540_v34 }
  0xe4   : > { %v572_v42 = vmul.f32 %v564_v29, %v558_v36  ;;  %v551_v43 = vsub.f32 1.5, %v550_v39 }
  0xe5   : > { %v585_v44 = vadd.f32 %v577_v32, %v571_v40  ;;  %v542_v45 = vmul.f32 %v794_v14, %v541_v41 }
  0xe6   : > { %v586_v47 = vadd.f32 %v578_v38, %v572_v42  ;;  %v552_v19 = vmul.f32 %v796_v17, %v551_v43 }
  0xe7   : > { %vm589_vm14 = vcmp.gt.f32.partialorder %v585_v44, 0.0  ;;  %v593_v49 = vmul.f32 0.2, %v585_v44  ;;  %v546_v21 = vsel %vm545_vm12, %v794_v14, %v542_v45 }
  0xe8   : > { %vm590_vm0 = vcmp.gt.f32.partialorder %v586_v47, 0.0  ;;  %v594_v51 = vmul.f32 0.2, %v586_v47  ;;  %v559_v52 = vmul.f32 %v546_v21, %v920_v35  ;;  %v556_v53 = vsel %vm555_vm15, %v796_v17, %v552_v19 }
  0xe9   : > { %v560_v54 = vmul.f32 %v556_v53, %v922_v37  ;;  %v597_v57 = vsel %vm589_vm14, %v585_v44, %v593_v49 }
  0xea   : > { %v573_v56 = vmul.f32 %v565_v46, %v559_v52  ;;  %v598_v58 = vsel %vm590_vm0, %v586_v47, %v594_v51 }
  0xeb   : > { %v574_v59 = vmul.f32 %v566_v48, %v560_v54  ;;  %v601_v62 = vpack.c.bf16 %v598_v58, %v597_v57 }
  0xec   : > { %v587_v60 = vadd.f32 %v579_v50, %v573_v56 }
  0xed   : > { %v588_v61 = vadd.f32 %v580_v55, %v574_v59  ;;  %v605_v3 = vrot.slane %v601_v62, 3 }
  0xee   : > { %vm591_vm2 = vcmp.gt.f32.partialorder %v587_v60, 0.0  ;;  %v595_v63 = vmul.f32 0.2, %v587_v60 }
  0xef   : > { %vm592_vm3 = vcmp.gt.f32.partialorder %v588_v61, 0.0  ;;  %v596_v0 = vmul.f32 0.2, %v588_v61  ;;  %v611_v5 = vsel %vm608_vm4, %v601_v62, %v605_v3 }
  0xf0   : > { %v599_v1 = vsel %vm591_vm2, %v587_v60, %v595_v63 }
  0xf1   : > { %v600_v2 = vsel %vm592_vm3, %v588_v61, %v596_v0 }
  0xf2   : > { %v602_v35 = vpack.c.bf16 %v600_v2, %v599_v1 }
  0xf4   : > { %v606_v37 = vrot.slane %v602_v35, 6  ;;  %v607_v4 = vrot.slane %v602_v35, 1 }
  0xf6   : > { %v615_v7 = vsel %vm612_vm5, %v606_v37, %v607_v4 }
  0xf7   : > { %v616_v8 = vsel %vm433_vm1, %v611_v5, %v615_v7 }
  0xf8   : > { %618 = vst [vmem:[%s314_s28] sm:$0xf] %v616_v8 }
  0xf9 PF: > { %p12_p9 = scmp.ge.s32.totalorder %s869_s22, 10   ;;  %s967_s18 = smov %s815_s19 }
  0xfa   : > { %s968_s19 = smov %s878_s25  ;;  %s969_s20 = smov %s869_s22 }
  0xfb   :  { %14 = sbr.rel (!%p12_p9) target bundleno = 2 (0x2), region = 107 }

// kernel: discriminator_forward.7
= control target key start
LH: loop header
LB: loop body
LE: loop exit
PB: predicated region body
PF: predicated region fallthrough
CT: control target
= control target key end

     0   :  { %vm555_vm0 = vcmask 523264   ;;  %vm825_vm1 = vcmask 130048   ;;  %s1756_s1 = inlined_call_operand.vmem [shape: bf16[576,16], index: 1, kind: input, shape index: {}]   ;;  %s1757_s2 = inlined_call_operand.vmem [shape: f32[1,16], index: 2, kind: input, shape index: {}]   ;;  %s1758_s0 = inlined_call_operand.vmem [shape: bf16[128,576], index: 0, kind: input, shape index: {}]   ;;  %s1759_s3 = inlined_call_operand.vmem [shape: f32[128,16], index: 3, kind: output, shape index: {}]  }
   0x1   :  { %v1205_v0 = vld [vmem:[%s1756_s1 + $0x38] sm:$0xff]  ;;  %v1204_v1 = vld [vmem:[%s1756_s1 + $0x30] sm:$0xff]  ;;  %v1203_v2 = vld [vmem:[%s1756_s1 + $0x28] sm:$0xff] }
   0x2   :  { %1234 = vmatpush.bf16.msra.mxu1 %v1205_v0  ;;  %1235 = vmatpush.bf16.msra.mxu2 %v1205_v0  ;;  %v1202_v3 = vld [vmem:[%s1756_s1 + $0x20] sm:$0xff]  ;;  %v1201_v4 = vld [vmem:[%s1756_s1 + $0x18] sm:$0xff]  ;;  %v1200_v5 = vld [vmem:[%s1756_s1 + $0x10] sm:$0xff] }
   0x3   :  { %1236 = vmatpush.bf16.msra.mxu3 %v1205_v0  ;;  %580 = vmatpush.bf16.msra.mxu0 %v1205_v0  ;;  %v1199_v6 = vld [vmem:[%s1756_s1 + $0x8] sm:$0xff]  ;;  %v1198_v7 = vld [vmem:[%s1756_s1] sm:$0xff]  ;;  %v888_v8 = vld [vmem:[%s1758_s0 + $0x50] sm:$0xf] }
   0x4   :  { %v1170_v9 = vld [vmem:[%s1758_s0 + $0x60] sm:$0xf0]  ;;  %v928_v10 = vld [vmem:[%s1758_s0 + $0xa0] sm:$0xf]  ;;  %v1180_v11 = vld [vmem:[%s1758_s0 + $0xb0] sm:$0xf0] }
   0x5   :  { %v968_v12 = vld [vmem:[%s1758_s0 + $0xf0] sm:$0xf]  ;;  %v1190_v13 = vld [vmem:[%s1758_s0 + $0x100] sm:$0xf0]  ;;  %v848_v14 = vld [vmem:[%s1758_s0] sm:$0xf]  ;;  %v889_v18 = vor.u32 %v1170_v9, %v888_v8  ;;  %v929_v19 = vor.u32 %v1180_v11, %v928_v10 }
   0x6   :  { %1237 = vmatpush.bf16.msra.mxu1 %v1204_v1  ;;  %1238 = vmatpush.bf16.msra.mxu2 %v1204_v1  ;;  %v1160_v15 = vld [vmem:[%s1758_s0 + $0x10] sm:$0xf0]  ;;  %v1221_v16 = vld [vmem:[%s1756_s1 + $0xb8] sm:$0xff]  ;;  %v969_v20 = vor.u32 %v1190_v13, %v968_v12  ;;  %v1219_v28 = vld [vmem:[%s1756_s1 + $0xa8] sm:$0xff] }
   0x7   :  { %1239 = vmatpush.bf16.msra.mxu3 %v1204_v1  ;;  %581 = vmatpush.bf16.msra.mxu0 %v1204_v1  ;;  %v1213_v17 = vld [vmem:[%s1756_s1 + $0x78] sm:$0xff]  ;;  %v849_v21 = vor.u32 %v1160_v15, %v848_v14  ;;  %v1220_v24 = vld [vmem:[%s1756_s1 + $0xb0] sm:$0xff]  ;;  %v1211_v29 = vld [vmem:[%s1756_s1 + $0x68] sm:$0xff] }
   0x8   :  { %v1229_v22 = vld [vmem:[%s1756_s1 + $0xf8] sm:$0xff]  ;;  %v1212_v25 = vld [vmem:[%s1756_s1 + $0x70] sm:$0xff]  ;;  %v1227_v30 = vld [vmem:[%s1756_s1 + $0xe8] sm:$0xff] }
   0x9   :  { %v1233_v23 = vld [vmem:[%s1756_s1 + $0x118] sm:$0xff]  ;;  %v1228_v26 = vld [vmem:[%s1756_s1 + $0xf0] sm:$0xff]  ;;  %v1231_v31 = vld [vmem:[%s1756_s1 + $0x108] sm:$0xff] }
   0xa   :  { %1240 = vmatpush.bf16.msra.mxu1 %v1203_v2  ;;  %1241 = vmatpush.bf16.msra.mxu2 %v1203_v2  ;;  %v1232_v27 = vld [vmem:[%s1756_s1 + $0x110] sm:$0xff]  ;;  %v1218_v32 = vld [vmem:[%s1756_s1 + $0xa0] sm:$0xff]  ;;  %v908_v35 = vld [vmem:[%s1758_s0 + $0x78] sm:$0xf] }
   0xb   :  { %1242 = vmatpush.bf16.msra.mxu3 %v1203_v2  ;;  %582 = vmatpush.bf16.msra.mxu0 %v1203_v2  ;;  %v1210_v33 = vld [vmem:[%s1756_s1 + $0x60] sm:$0xff]  ;;  %v1175_v36 = vld [vmem:[%s1758_s0 + $0x88] sm:$0xf0]  ;;  %v948_v37 = vld [vmem:[%s1758_s0 + $0xc8] sm:$0xf] }
   0xc   :  { %v1226_v34 = vld [vmem:[%s1756_s1 + $0xe0] sm:$0xff]  ;;  %v1185_v38 = vld [vmem:[%s1758_s0 + $0xd8] sm:$0xf0]  ;;  %v988_v39 = vld [vmem:[%s1758_s0 + $0x118] sm:$0xf]  ;;  %v909_v46 = vor.u32 %v1175_v36, %v908_v35 }
   0xd   :  { %v1195_v40 = vld [vmem:[%s1758_s0 + $0x128] sm:$0xf0]  ;;  %v868_v41 = vld [vmem:[%s1758_s0 + $0x28] sm:$0xf]  ;;  %v1165_v42 = vld [vmem:[%s1758_s0 + $0x38] sm:$0xf0]  ;;  %v949_v47 = vor.u32 %v1185_v38, %v948_v37 }
   0xe   :  { %1243 = vmatpush.bf16.msra.mxu1 %v1202_v3  ;;  %1244 = vmatpush.bf16.msra.mxu2 %v1202_v3  ;;  %v1230_v43 = vld [vmem:[%s1756_s1 + $0x100] sm:$0xff]  ;;  %v1217_v44 = vld [vmem:[%s1756_s1 + $0x98] sm:$0xff]  ;;  %v989_v48 = vor.u32 %v1195_v40, %v988_v39  ;;  %v869_v49 = vor.u32 %v1165_v42, %v868_v41  ;;  %v1216_v51 = vld [vmem:[%s1756_s1 + $0x90] sm:$0xff] }
   0xf   :  { %1245 = vmatpush.bf16.msra.mxu3 %v1202_v3  ;;  %583 = vmatpush.bf16.msra.mxu0 %v1202_v3  ;;  %v1209_v45 = vld [vmem:[%s1756_s1 + $0x58] sm:$0xff]  ;;  %v1208_v52 = vld [vmem:[%s1756_s1 + $0x50] sm:$0xff]  ;;  %v1215_v54 = vld [vmem:[%s1756_s1 + $0x88] sm:$0xff] }
  0x10   :  { %v1225_v50 = vld [vmem:[%s1756_s1 + $0xd8] sm:$0xff]  ;;  %v1224_v53 = vld [vmem:[%s1756_s1 + $0xd0] sm:$0xff]  ;;  %v1207_v55 = vld [vmem:[%s1756_s1 + $0x48] sm:$0xff] }
  0x11   :  { %v1223_v56 = vld [vmem:[%s1756_s1 + $0xc8] sm:$0xff]  ;;  %v1214_v57 = vld [vmem:[%s1756_s1 + $0x80] sm:$0xff]  ;;  %v850_v61 = vld [vmem:[%s1758_s0 + $0x14] sm:$0xf0] }
  0x12   :  { %1246 = vmatpush.bf16.msra.mxu1 %v1201_v4  ;;  %1247 = vmatpush.bf16.msra.mxu2 %v1201_v4  ;;  %v1206_v58 = vld [vmem:[%s1756_s1 + $0x40] sm:$0xff]  ;;  %v856_v62 = vld [vmem:[%s1758_s0 + $0x8] sm:$0xf]  ;;  %v1161_v63 = vld [vmem:[%s1758_s0 + $0x18] sm:$0xf0] }
  0x13   :  { %1248 = vmatpush.bf16.msra.mxu3 %v1201_v4  ;;  %584 = vmatpush.bf16.msra.mxu0 %v1201_v4  ;;  %v1222_v59 = vld [vmem:[%s1756_s1 + $0xc0] sm:$0xff]  ;;  %v1159_v0 = vld [vmem:[%s1758_s0 + $0xc] sm:$0xf]  ;;  %v864_v2 = vld [vmem:[%s1758_s0 + $0x10] sm:$0xf] }
  0x14   :  { %v1158_v60 = vld [vmem:[%s1758_s0 + $0x4] sm:$0xf]  ;;  %v858_v1 = vld [vmem:[%s1758_s0 + $0x1c] sm:$0xf0]  ;;  %v1163_v8 = vld [vmem:[%s1758_s0 + $0x2c] sm:$0xf] }
  0x15   :  { %v1162_v3 = vld [vmem:[%s1758_s0 + $0x20] sm:$0xf0]  ;;  %v853_v4 = vor.u32 %v1158_v60, %v850_v61  ;;  %v870_v9 = vld [vmem:[%s1758_s0 + $0x3c] sm:$0xf0]  ;;  %v876_v10 = vld [vmem:[%s1758_s0 + $0x30] sm:$0xf] }
  0x16   :  { %1249 = vmatpush.bf16.msra.mxu1 %v1200_v5  ;;  %1250 = vmatpush.bf16.msra.mxu2 %v1200_v5  ;;  %v1166_v11 = vld [vmem:[%s1758_s0 + $0x40] sm:$0xf0]  ;;  %v1164_v12 = vld [vmem:[%s1758_s0 + $0x34] sm:$0xf]  ;;  %v878_v13 = vld [vmem:[%s1758_s0 + $0x44] sm:$0xf0] }
  0x17   :  { %1251 = vmatpush.bf16.msra.mxu3 %v1200_v5  ;;  %585 = vmatpush.bf16.msra.mxu0 %v1200_v5  ;;  %v857_v5 = vor.u32 %v1161_v63, %v856_v62  ;;  %v884_v14 = vld [vmem:[%s1758_s0 + $0x38] sm:$0xf]  ;;  %v1167_v15 = vld [vmem:[%s1758_s0 + $0x48] sm:$0xf0]  ;;  %v1176_v35 = vld [vmem:[%s1758_s0 + $0x90] sm:$0xf0] }
  0x18   :  { %v1174_v36 = vld [vmem:[%s1758_s0 + $0x84] sm:$0xf]  ;;  %v918_v37 = vld [vmem:[%s1758_s0 + $0x94] sm:$0xf0]  ;;  %v924_v38 = vld [vmem:[%s1758_s0 + $0x88] sm:$0xf] }
  0x19   :  { %v1177_v39 = vld [vmem:[%s1758_s0 + $0x98] sm:$0xf0]  ;;  %v921_v42 = vor.u32 %v1174_v36, %v918_v37  ;;  %v1184_v60 = vld [vmem:[%s1758_s0 + $0xd4] sm:$0xf]  ;;  %v958_v61 = vld [vmem:[%s1758_s0 + $0xe4] sm:$0xf0] }
  0x1a   :  { %1252 = vmatpush.bf16.msra.mxu1 %v1199_v6  ;;  %1253 = vmatpush.bf16.msra.mxu2 %v1199_v6  ;;  %v964_v62 = vld [vmem:[%s1758_s0 + $0xd8] sm:$0xf]  ;;  %v1187_v63 = vld [vmem:[%s1758_s0 + $0xe8] sm:$0xf0] }
  0x1b   :  { %1254 = vmatpush.bf16.msra.mxu3 %v1199_v6  ;;  %586 = vmatpush.bf16.msra.mxu0 %v1199_v6  ;;  %v861_v6 = vor.u32 %v1159_v0, %v858_v1 }
  0x1e   :  { %1255 = vmatpush.bf16.msra.mxu1 %v1198_v7  ;;  %1256 = vmatpush.bf16.msra.mxu2 %v1198_v7 }
  0x1f   :  { %1257 = vmatpush.bf16.msra.mxu3 %v1198_v7  ;;  %587 = vmatpush.bf16.msra.mxu0 %v1198_v7  ;;  %v865_v7 = vor.u32 %v1162_v3, %v864_v2  ;;  %v961_v2 = vor.u32 %v1184_v60, %v958_v61  ;;  %v965_v3 = vor.u32 %v1187_v63, %v964_v62 }
  0x21   :  { %598 = vmatmul.bf16.vlgmr.msra.gmra.mxu1 %v889_v18  ;;  %608 = vmatmul.bf16.vlgmr.msra.gmra.mxu2 %v929_v19  ;;  %v881_v18 = vor.u32 %v1164_v12, %v878_v13  ;;  %v885_v19 = vor.u32 %v1167_v15, %v884_v14 }
  0x22   :  { %678 = vmatpush.bf16.msrb.mxu2 %v1221_v16  ;;  %629 = vmatpush.bf16.msrb.mxu1 %v1213_v17  ;;  %v873_v16 = vor.u32 %v1163_v8, %v870_v9  ;;  %v877_v17 = vor.u32 %v1166_v11, %v876_v10  ;;  %v1189_v8 = vld [vmem:[%s1758_s0 + $0xfc] sm:$0xf]  ;;  %v978_v9 = vld [vmem:[%s1758_s0 + $0x10c] sm:$0xf0]  ;;  %v984_v10 = vld [vmem:[%s1758_s0 + $0x100] sm:$0xf] }
  0x23   :  { %618 = vmatmul.bf16.vlgmr.msra.gmra.mxu3 %v969_v20  ;;  %588 = vmatmul.bf16.vlgmr.msra.gmra.mxu0 %v849_v21  ;;  %v1168_v20 = vld [vmem:[%s1758_s0 + $0x54] sm:$0xf]  ;;  %v890_v21 = vld [vmem:[%s1758_s0 + $0x64] sm:$0xf0]  ;;  %v981_v15 = vor.u32 %v1189_v8, %v978_v9 }
  0x24   :  { %727 = vmatpush.bf16.msrb.mxu3 %v1229_v22  ;;  %780 = vmatpush.bf16.msrb.mxu0 %v1233_v23  ;;  %v896_v22 = vld [vmem:[%s1758_s0 + $0x58] sm:$0xf]  ;;  %v1171_v23 = vld [vmem:[%s1758_s0 + $0x68] sm:$0xf0]  ;;  %v1192_v11 = vld [vmem:[%s1758_s0 + $0x110] sm:$0xf0] }
  0x26   :  { %679 = vmatpush.bf16.msrb.mxu2 %v1220_v24  ;;  %630 = vmatpush.bf16.msrb.mxu1 %v1212_v25  ;;  %v1169_v24 = vld [vmem:[%s1758_s0 + $0x5c] sm:$0xf]  ;;  %v898_v25 = vld [vmem:[%s1758_s0 + $0x6c] sm:$0xf0] }
  0x28   :  { %728 = vmatpush.bf16.msrb.mxu3 %v1228_v26  ;;  %781 = vmatpush.bf16.msrb.mxu0 %v1232_v27  ;;  %v904_v26 = vld [vmem:[%s1758_s0 + $0x60] sm:$0xf]  ;;  %v1172_v27 = vld [vmem:[%s1758_s0 + $0x70] sm:$0xf0] }
  0x2a   :  { %680 = vmatpush.bf16.msrb.mxu2 %v1219_v28  ;;  %631 = vmatpush.bf16.msrb.mxu1 %v1211_v29  ;;  %v893_v28 = vor.u32 %v1168_v20, %v890_v21  ;;  %v897_v29 = vor.u32 %v1171_v23, %v896_v22 }
  0x2c   :  { %729 = vmatpush.bf16.msrb.mxu3 %v1227_v30  ;;  %782 = vmatpush.bf16.msrb.mxu0 %v1231_v31  ;;  %v901_v30 = vor.u32 %v1169_v24, %v898_v25  ;;  %v905_v31 = vor.u32 %v1172_v27, %v904_v26  ;;  %v1193_v25 = vld [vmem:[%s1758_s0 + $0x11c] sm:$0xf]  ;;  %v990_v26 = vld [vmem:[%s1758_s0 + $0x12c] sm:$0xf0]  ;;  %v996_v27 = vld [vmem:[%s1758_s0 + $0x120] sm:$0xf] }
  0x2d   :  { %v993_v36 = vor.u32 %v1193_v25, %v990_v26 }
  0x2e   :  { %681 = vmatpush.bf16.msrb.mxu2 %v1218_v32  ;;  %632 = vmatpush.bf16.msrb.mxu1 %v1210_v33  ;;  %v1173_v32 = vld [vmem:[%s1758_s0 + $0x7c] sm:$0xf]  ;;  %v910_v33 = vld [vmem:[%s1758_s0 + $0x8c] sm:$0xf0] }
  0x2f   :  { %v913_v40 = vor.u32 %v1173_v32, %v910_v33  ;;  %v1197_v32 = vld [vmem:[%s1758_s0 + $0x138] sm:$0xf0] }
  0x30   :  { %730 = vmatpush.bf16.msrb.mxu3 %v1226_v34  ;;  %783 = vmatpush.bf16.msrb.mxu0 %v1230_v43  ;;  %v916_v34 = vld [vmem:[%s1758_s0 + $0x80] sm:$0xf]  ;;  %v925_v43 = vor.u32 %v1177_v39, %v924_v38 }
  0x31   :  { %603 = vmatmul.bf16.gmra.mxu1 %v909_v46  ;;  %613 = vmatmul.bf16.gmra.mxu2 %v949_v47  ;;  %v917_v41 = vor.u32 %v1176_v35, %v916_v34  ;;  %v936_v46 = vld [vmem:[%s1758_s0 + $0xa8] sm:$0xf]  ;;  %v1181_v47 = vld [vmem:[%s1758_s0 + $0xb8] sm:$0xf0] }
  0x32   :  { %682 = vmatpush.bf16.msrb.mxu2 %v1217_v44  ;;  %633 = vmatpush.bf16.msrb.mxu1 %v1209_v45  ;;  %v1178_v44 = vld [vmem:[%s1758_s0 + $0xa4] sm:$0xf]  ;;  %v930_v45 = vld [vmem:[%s1758_s0 + $0xb4] sm:$0xf0] }
  0x33   :  { %623 = vmatmul.bf16.gmra.mxu3 %v989_v48  ;;  %593 = vmatmul.bf16.gmra.mxu0 %v869_v49  ;;  %v1179_v48 = vld [vmem:[%s1758_s0 + $0xac] sm:$0xf]  ;;  %v938_v49 = vld [vmem:[%s1758_s0 + $0xbc] sm:$0xf0] }
  0x34   :  { %731 = vmatpush.bf16.msrb.mxu3 %v1225_v50  ;;  %v944_v50 = vld [vmem:[%s1758_s0 + $0xb0] sm:$0xf] }
  0x36   :  { %683 = vmatpush.bf16.msrb.mxu2 %v1216_v51  ;;  %634 = vmatpush.bf16.msrb.mxu1 %v1208_v52  ;;  %v1182_v51 = vld [vmem:[%s1758_s0 + $0xc0] sm:$0xf0]  ;;  %v933_v52 = vor.u32 %v1178_v44, %v930_v45 }
  0x38   :  { %732 = vmatpush.bf16.msrb.mxu3 %v1224_v53  ;;  %v937_v53 = vor.u32 %v1181_v47, %v936_v46 }
  0x3a   :  { %684 = vmatpush.bf16.msrb.mxu2 %v1215_v54  ;;  %635 = vmatpush.bf16.msrb.mxu1 %v1207_v55  ;;  %v941_v54 = vor.u32 %v1179_v48, %v938_v49  ;;  %v945_v55 = vor.u32 %v1182_v51, %v944_v50 }
  0x3c   :  { %733 = vmatpush.bf16.msrb.mxu3 %v1223_v56  ;;  %v1183_v56 = vld [vmem:[%s1758_s0 + $0xcc] sm:$0xf] }
  0x3e   :  { %685 = vmatpush.bf16.msrb.mxu2 %v1214_v57  ;;  %636 = vmatpush.bf16.msrb.mxu1 %v1206_v58  ;;  %v950_v57 = vld [vmem:[%s1758_s0 + $0xdc] sm:$0xf0]  ;;  %v956_v58 = vld [vmem:[%s1758_s0 + $0xd0] sm:$0xf] }
  0x3f   :  { %v953_v0 = vor.u32 %v1183_v56, %v950_v57 }
  0x40   :  { %734 = vmatpush.bf16.msrb.mxu3 %v1222_v59  ;;  %v1186_v59 = vld [vmem:[%s1758_s0 + $0xe0] sm:$0xf0] }
  0x41   :  { %637 = vmatmul.bf16.vlgmr.msrb.gmra.mxu1 %v853_v4  ;;  %686 = vmatmul.bf16.vlgmr.msrb.gmra.mxu2 %v857_v5  ;;  %v957_v1 = vor.u32 %v1186_v59, %v956_v58  ;;  %v1188_v4 = vld [vmem:[%s1758_s0 + $0xf4] sm:$0xf]  ;;  %v970_v5 = vld [vmem:[%s1758_s0 + $0x104] sm:$0xf0] }
  0x42   :  { %v973_v12 = vor.u32 %v1188_v4, %v970_v5 }
  0x43   :  { %735 = vmatmul.bf16.vlgmr.msrb.gmra.mxu3 %v861_v6  ;;  %1150 = vmatmul.msk.bf16.vlgmr.msrb.gmra.mxu0 %vm555_vm0, %v865_v7  ;;  %v976_v6 = vld [vmem:[%s1758_s0 + $0xf8] sm:$0xf]  ;;  %v1191_v7 = vld [vmem:[%s1758_s0 + $0x108] sm:$0xf0] }
  0x44   :  { %v977_v13 = vor.u32 %v1191_v7, %v976_v6 }
  0x51   :  { %642 = vmatmul.bf16.gmra.mxu1 %v873_v16  ;;  %691 = vmatmul.bf16.gmra.mxu2 %v877_v17  ;;  %v985_v16 = vor.u32 %v1192_v11, %v984_v10 }
  0x53   :  { %740 = vmatmul.bf16.gmra.mxu3 %v881_v18  ;;  %1151 = vmatmul.msk.bf16.gmra.mxu0 %vm555_vm0, %v885_v19  ;;  %v1615_v18 = vld [vmem:[%s1757_s2] ss:$0 sm:$0xff] }
  0x61   :  { %647 = vmatmul.bf16.gmra.mxu1 %v893_v28  ;;  %696 = vmatmul.bf16.gmra.mxu2 %v897_v29  ;;  %v1196_v28 = vld [vmem:[%s1758_s0 + $0x130] sm:$0xf0]  ;;  %v1194_v29 = vld [vmem:[%s1758_s0 + $0x124] sm:$0xf] }
  0x62   :  { %v997_v37 = vor.u32 %v1196_v28, %v996_v27 }
  0x63   :  { %745 = vmatmul.bf16.gmra.mxu3 %v901_v30  ;;  %1152 = vmatmul.msk.bf16.gmra.mxu0 %vm555_vm0, %v905_v31  ;;  %v998_v30 = vld [vmem:[%s1758_s0 + $0x134] sm:$0xf0]  ;;  %v1004_v31 = vld [vmem:[%s1758_s0 + $0x128] sm:$0xf] }
  0x71   :  { %652 = vmatmul.bf16.gmra.mxu1 %v913_v40  ;;  %701 = vmatmul.bf16.gmra.mxu2 %v917_v41  ;;  %v1001_v40 = vor.u32 %v1194_v29, %v998_v30  ;;  %v1005_v41 = vor.u32 %v1197_v32, %v1004_v31 }
  0x73   :  { %750 = vmatmul.bf16.gmra.mxu3 %v921_v42  ;;  %1153 = vmatmul.msk.bf16.gmra.mxu0 %vm555_vm0, %v925_v43 }
  0x81   :  { %657 = vmatmul.bf16.gmra.mxu1 %v933_v52  ;;  %706 = vmatmul.bf16.gmra.mxu2 %v937_v53 }
  0x83   :  { %755 = vmatmul.bf16.gmra.mxu3 %v941_v54  ;;  %1154 = vmatmul.msk.bf16.gmra.mxu0 %vm555_vm0, %v945_v55 }
  0x91   :  { %662 = vmatmul.bf16.gmra.mxu1 %v953_v0  ;;  %711 = vmatmul.bf16.gmra.mxu2 %v957_v1 }
  0x93   :  { %760 = vmatmul.bf16.gmra.mxu3 %v961_v2  ;;  %1155 = vmatmul.msk.bf16.gmra.mxu0 %vm555_vm0, %v965_v3 }
  0x9e   :  { %v1609_v14 = vpop.f32.mrf.mxu1 }
  0x9f   :  { %v600_v31 = vadd.f32 %v1615_v18, %v1609_v14 }
  0xa0   :  { %v589_v17 = vpop.f32.mrf.mxu0 }
  0xa1   :  { %667 = vmatmul.bf16.gmra.mxu1 %v973_v12  ;;  %716 = vmatmul.bf16.gmra.mxu2 %v977_v13  ;;  %v590_v55 = vadd.f32 %v1615_v18, %v589_v17 }
  0xa3   :  { %765 = vmatmul.bf16.gmra.mxu3 %v981_v15  ;;  %1156 = vmatmul.msk.bf16.gmra.mxu0 %vm555_vm0, %v985_v16 }
  0xa4   :  { %v609_v19 = vpop.f32.mrf.mxu2 }
  0xa5   :  { %v1618_v20 = vadd.f32 %v1615_v18, %v609_v19 }
  0xa6   :  { %v619_v21 = vpop.f32.mrf.mxu3  ;;  %v1623_v23 = vpop.f32.mrf.mxu1 }
  0xa7   :  { %v1621_v22 = vadd.f32 %v1615_v18, %v619_v21 }
  0xa8   :  { %v591_v24 = vpop.f32.mrf.mxu0 }
  0xa9   :  { %v592_v63 = vadd.f32 %v1615_v18, %v591_v24 }
  0xac   :  { %v611_v33 = vpop.f32.mrf.mxu2 }
  0xad   :  { %v1650_v34 = vadd.f32 %v1615_v18, %v611_v33 }
  0xae   :  { %v621_v35 = vpop.f32.mrf.mxu3  ;;  %v1655_v39 = vpop.f32.mrf.mxu1 }
  0xaf   :  { %v1653_v38 = vadd.f32 %v1615_v18, %v621_v35 }
  0xb0   :  { %v594_v42 = vpop.f32.mrf.mxu0 }
  0xb1   :  { %672 = vmatmul.bf16.gmra.mxu1 %v993_v36  ;;  %721 = vmatmul.bf16.gmra.mxu2 %v997_v37  ;;  %v595_v8 = vadd.f32 %v1615_v18, %v594_v42 }
  0xb3   :  { %770 = vmatmul.bf16.gmra.mxu3 %v1001_v40  ;;  %1157 = vmatmul.msk.bf16.gmra.mxu0 %vm555_vm0, %v1005_v41 }
  0xb4   :  { %v614_v43 = vpop.f32.mrf.mxu2 }
  0xb5   :  { %v1659_v44 = vadd.f32 %v1615_v18, %v614_v43  ;;  %v602_v43 = vadd.f32 %v1615_v18, %v1623_v23 }
  0xb6   :  { %v624_v45 = vpop.f32.mrf.mxu3  ;;  %v1664_v47 = vpop.f32.mrf.mxu1 }
  0xb7   :  { %v1662_v46 = vadd.f32 %v1615_v18, %v624_v45 }
  0xb8   :  { %v596_v48 = vpop.f32.mrf.mxu0 }
  0xb9   :  { %v597_v19 = vadd.f32 %v1615_v18, %v596_v48 }
  0xbc   :  { %v616_v49 = vpop.f32.mrf.mxu2 }
  0xbd   :  { %v1667_v50 = vadd.f32 %v1615_v18, %v616_v49 }
  0xbe   :  { %v626_v51 = vpop.f32.mrf.mxu3  ;;  %v638_v53 = vpop.f32.mrf.mxu1 }
  0xbf   :  { %v1670_v52 = vadd.f32 %v1615_v18, %v626_v51  ;;  %v639_v56 = vadd.f32 %v638_v53, %v590_v55 }
  0xc0   :  { %v785_v54 = vpop.f32.mrf.mxu0 }
  0xc4   :  { %v687_v57 = vpop.f32.mrf.mxu2 }
  0xc5   :  { %v688_v58 = vadd.f32 %v687_v57, %v639_v56  ;;  %v605_v56 = vadd.f32 %v1615_v18, %v1655_v39 }
  0xc6   :  { %v736_v59 = vpop.f32.mrf.mxu3  ;;  %v640_v60 = vpop.f32.mrf.mxu1 }
  0xc7   :  { %v737_v61 = vadd.f32 %v736_v59, %v688_v58  ;;  %v641_v1 = vadd.f32 %v640_v60, %v592_v63 }
  0xc8   :  { %v787_v62 = vpop.f32.mrf.mxu0 }
  0xc9   :  { %v786_v0 = vadd.f32 %v785_v54, %v737_v61 }
  0xcb   :  { %826 = vst.msk [vmem:[%s1759_s3] sm:$0xff] %vm825_vm1, %v786_v0  ;;  %v607_v0 = vadd.f32 %v1615_v18, %v1664_v47 }
  0xcc   :  { %v689_v2 = vpop.f32.mrf.mxu2 }
  0xcd   :  { %v690_v3 = vadd.f32 %v689_v2, %v641_v1 }
  0xce   :  { %v738_v4 = vpop.f32.mrf.mxu3  ;;  %v643_v5 = vpop.f32.mrf.mxu1 }
  0xcf   :  { %v739_v6 = vadd.f32 %v738_v4, %v690_v3  ;;  %v644_v10 = vadd.f32 %v643_v5, %v595_v8 }
  0xd0   :  { %v790_v7 = vpop.f32.mrf.mxu0 }
  0xd1   :  { %v788_v9 = vadd.f32 %v787_v62, %v739_v6 }
  0xd3   :  { %827 = vst.msk [vmem:[%s1759_s3 + $0x8] sm:$0xff] %vm825_vm1, %v788_v9 }
  0xd4   :  { %v692_v11 = vpop.f32.mrf.mxu2 }
  0xd5   :  { %v693_v12 = vadd.f32 %v692_v11, %v644_v10 }
  0xd6   :  { %v741_v13 = vpop.f32.mrf.mxu3  ;;  %v645_v15 = vpop.f32.mrf.mxu1 }
  0xd7   :  { %v742_v16 = vadd.f32 %v741_v13, %v693_v12  ;;  %v646_v24 = vadd.f32 %v645_v15, %v597_v19 }
  0xd8   :  { %v792_v17 = vpop.f32.mrf.mxu0 }
  0xd9   :  { %v791_v21 = vadd.f32 %v790_v7, %v742_v16 }
  0xdb   :  { %828 = vst.msk [vmem:[%s1759_s3 + $0x10] sm:$0xff] %vm825_vm1, %v791_v21 }
  0xdc   :  { %v694_v25 = vpop.f32.mrf.mxu2 }
  0xdd   :  { %v695_v26 = vadd.f32 %v694_v25, %v646_v24 }
  0xde   :  { %v743_v27 = vpop.f32.mrf.mxu3  ;;  %v648_v28 = vpop.f32.mrf.mxu1 }
  0xdf   :  { %v744_v29 = vadd.f32 %v743_v27, %v695_v26  ;;  %v649_v33 = vadd.f32 %v648_v28, %v600_v31 }
  0xe0   :  { %v795_v30 = vpop.f32.mrf.mxu0 }
  0xe1   :  { %v793_v32 = vadd.f32 %v792_v17, %v744_v29 }
  0xe3   :  { %829 = vst.msk [vmem:[%s1759_s3 + $0x18] sm:$0xff] %vm825_vm1, %v793_v32 }
  0xe4   :  { %v697_v35 = vpop.f32.mrf.mxu2 }
  0xe5   :  { %v698_v36 = vadd.f32 %v697_v35, %v649_v33 }
  0xe6   :  { %v746_v37 = vpop.f32.mrf.mxu3  ;;  %v650_v40 = vpop.f32.mrf.mxu1 }
  0xe7   :  { %v747_v41 = vadd.f32 %v746_v37, %v698_v36  ;;  %v651_v14 = vadd.f32 %v650_v40, %v602_v43 }
  0xe8   :  { %v797_v42 = vpop.f32.mrf.mxu0 }
  0xe9   :  { %v796_v45 = vadd.f32 %v795_v30, %v747_v41 }
  0xeb   :  { %830 = vst.msk [vmem:[%s1759_s3 + $0x20] sm:$0xff] %vm825_vm1, %v796_v45 }
  0xec   :  { %v699_v48 = vpop.f32.mrf.mxu2 }
  0xed   :  { %v700_v49 = vadd.f32 %v699_v48, %v651_v14 }
  0xee   :  { %v748_v51 = vpop.f32.mrf.mxu3  ;;  %v653_v53 = vpop.f32.mrf.mxu1 }
  0xef   :  { %v749_v54 = vadd.f32 %v748_v51, %v700_v49  ;;  %v654_v23 = vadd.f32 %v653_v53, %v605_v56 }
  0xf0   :  { %v800_v55 = vpop.f32.mrf.mxu0 }
  0xf1   :  { %v798_v57 = vadd.f32 %v797_v42, %v749_v54 }
  0xf3   :  { %831 = vst.msk [vmem:[%s1759_s3 + $0x28] sm:$0xff] %vm825_vm1, %v798_v57 }
  0xf4   :  { %v702_v58 = vpop.f32.mrf.mxu2 }
  0xf5   :  { %v703_v59 = vadd.f32 %v702_v58, %v654_v23 }
  0xf6   :  { %v751_v60 = vpop.f32.mrf.mxu3  ;;  %v655_v61 = vpop.f32.mrf.mxu1 }
  0xf7   :  { %v752_v62 = vadd.f32 %v751_v60, %v703_v59  ;;  %v656_v39 = vadd.f32 %v655_v61, %v607_v0 }
  0xf8   :  { %v802_v63 = vpop.f32.mrf.mxu0 }
  0xf9   :  { %v801_v1 = vadd.f32 %v800_v55, %v752_v62 }
  0xfb   :  { %832 = vst.msk [vmem:[%s1759_s3 + $0x30] sm:$0xff] %vm825_vm1, %v801_v1 }
  0xfc   :  { %v704_v2 = vpop.f32.mrf.mxu2 }
  0xfd   :  { %v705_v3 = vadd.f32 %v704_v2, %v656_v39 }
  0xfe   :  { %v753_v4 = vpop.f32.mrf.mxu3  ;;  %v658_v5 = vpop.f32.mrf.mxu1 }
  0xff   :  { %v754_v6 = vadd.f32 %v753_v4, %v705_v3  ;;  %v659_v18 = vadd.f32 %v658_v5, %v1618_v20 }
 0x100   :  { %v805_v7 = vpop.f32.mrf.mxu0 }
 0x101   :  { %v803_v8 = vadd.f32 %v802_v63, %v754_v6 }
 0x103   :  { %833 = vst.msk [vmem:[%s1759_s3 + $0x38] sm:$0xff] %vm825_vm1, %v803_v8 }
 0x104   :  { %v707_v47 = vpop.f32.mrf.mxu2 }
 0x105   :  { %v708_v9 = vadd.f32 %v707_v47, %v659_v18 }
 0x106   :  { %v756_v10 = vpop.f32.mrf.mxu3  ;;  %v660_v11 = vpop.f32.mrf.mxu1 }
 0x107   :  { %v757_v12 = vadd.f32 %v756_v10, %v708_v9  ;;  %v661_v16 = vadd.f32 %v660_v11, %v1650_v34 }
 0x108   :  { %v807_v13 = vpop.f32.mrf.mxu0 }
 0x109   :  { %v806_v15 = vadd.f32 %v805_v7, %v757_v12 }
 0x10b   :  { %834 = vst.msk [vmem:[%s1759_s3 + $0x40] sm:$0xff] %vm825_vm1, %v806_v15 }
 0x10c   :  { %v709_v17 = vpop.f32.mrf.mxu2 }
 0x10d   :  { %v710_v19 = vadd.f32 %v709_v17, %v661_v16 }
 0x10e   :  { %v758_v21 = vpop.f32.mrf.mxu3  ;;  %v663_v24 = vpop.f32.mrf.mxu1 }
 0x10f   :  { %v759_v25 = vadd.f32 %v758_v21, %v710_v19  ;;  %v664_v27 = vadd.f32 %v663_v24, %v1659_v44 }
 0x110   :  { %v810_v20 = vpop.f32.mrf.mxu0 }
 0x111   :  { %v808_v26 = vadd.f32 %v807_v13, %v759_v25 }
 0x113   :  { %835 = vst.msk [vmem:[%s1759_s3 + $0x48] sm:$0xff] %vm825_vm1, %v808_v26 }
 0x114   :  { %v712_v28 = vpop.f32.mrf.mxu2 }
 0x115   :  { %v713_v29 = vadd.f32 %v712_v28, %v664_v27 }
 0x116   :  { %v761_v30 = vpop.f32.mrf.mxu3  ;;  %v665_v31 = vpop.f32.mrf.mxu1 }
 0x117   :  { %v762_v32 = vadd.f32 %v761_v30, %v713_v29  ;;  %v666_v35 = vadd.f32 %v665_v31, %v1667_v50 }
 0x118   :  { %v812_v34 = vpop.f32.mrf.mxu0 }
 0x119   :  { %v811_v33 = vadd.f32 %v810_v20, %v762_v32 }
 0x11b   :  { %836 = vst.msk [vmem:[%s1759_s3 + $0x50] sm:$0xff] %vm825_vm1, %v811_v33 }
 0x11c   :  { %v714_v36 = vpop.f32.mrf.mxu2 }
 0x11d   :  { %v715_v37 = vadd.f32 %v714_v36, %v666_v35 }
 0x11e   :  { %v763_v40 = vpop.f32.mrf.mxu3  ;;  %v668_v41 = vpop.f32.mrf.mxu1 }
 0x11f   :  { %v764_v42 = vadd.f32 %v763_v40, %v715_v37  ;;  %v669_v45 = vadd.f32 %v668_v41, %v1621_v22 }
 0x120   :  { %v815_v43 = vpop.f32.mrf.mxu0 }
 0x121   :  { %v813_v44 = vadd.f32 %v812_v34, %v764_v42 }
 0x123   :  { %837 = vst.msk [vmem:[%s1759_s3 + $0x58] sm:$0xff] %vm825_vm1, %v813_v44 }
 0x124   :  { %v717_v14 = vpop.f32.mrf.mxu2 }
 0x125   :  { %v718_v48 = vadd.f32 %v717_v14, %v669_v45 }
 0x126   :  { %v766_v49 = vpop.f32.mrf.mxu3  ;;  %v670_v51 = vpop.f32.mrf.mxu1 }
 0x127   :  { %v767_v53 = vadd.f32 %v766_v49, %v718_v48  ;;  %v671_v54 = vadd.f32 %v670_v51, %v1653_v38 }
 0x128   :  { %v817_v55 = vpop.f32.mrf.mxu0 }
 0x129   :  { %v816_v50 = vadd.f32 %v815_v43, %v767_v53 }
 0x12b   :  { %838 = vst.msk [vmem:[%s1759_s3 + $0x60] sm:$0xff] %vm825_vm1, %v816_v50 }
 0x12c   :  { %v719_v56 = vpop.f32.mrf.mxu2 }
 0x12d   :  { %v720_v57 = vadd.f32 %v719_v56, %v671_v54 }
 0x12e   :  { %v768_v23 = vpop.f32.mrf.mxu3  ;;  %v673_v58 = vpop.f32.mrf.mxu1 }
 0x12f   :  { %v769_v59 = vadd.f32 %v768_v23, %v720_v57  ;;  %v674_v60 = vadd.f32 %v673_v58, %v1662_v46 }
 0x130   :  { %v820_v0 = vpop.f32.mrf.mxu0 }
 0x131   :  { %v818_v22 = vadd.f32 %v817_v55, %v769_v59 }
 0x133   :  { %839 = vst.msk [vmem:[%s1759_s3 + $0x68] sm:$0xff] %vm825_vm1, %v818_v22 }
 0x134   :  { %v722_v61 = vpop.f32.mrf.mxu2 }
 0x135   :  { %v723_v62 = vadd.f32 %v722_v61, %v674_v60 }
 0x136   :  { %v771_v63 = vpop.f32.mrf.mxu3  ;;  %v675_v38 = vpop.f32.mrf.mxu1 }
 0x137   :  { %v772_v1 = vadd.f32 %v771_v63, %v723_v62  ;;  %v676_v2 = vadd.f32 %v675_v38, %v1670_v52 }
 0x138   :  { %v822_v7 = vpop.f32.mrf.mxu0 }
 0x139   :  { %v821_v39 = vadd.f32 %v820_v0, %v772_v1 }
 0x13b   :  { %840 = vst.msk [vmem:[%s1759_s3 + $0x70] sm:$0xff] %vm825_vm1, %v821_v39 }
 0x13c   :  { %v724_v3 = vpop.f32.mrf.mxu2 }
 0x13d   :  { %v725_v4 = vadd.f32 %v724_v3, %v676_v2 }
 0x13e   :  { %v773_v5 = vpop.f32.mrf.mxu3 }
 0x13f   :  { %v774_v6 = vadd.f32 %v773_v5, %v725_v4 }
 0x141   :  { %v823_v46 = vadd.f32 %v822_v7, %v774_v6 }
 0x143   :  { %841 = vst.msk [vmem:[%s1759_s3 + $0x78] sm:$0xff] %vm825_vm1, %v823_v46 }

</bundles_post_ra>
